<compile_context>
chip_gen: v7x
topology: tpu7x:2x2x1
jax: 0.10.0
libtpu: 0.0.40
codegen_flags: <defaults>
</compile_context>

<pallas_src>
import functools

import jax
import jax.numpy as jnp
from jax import lax
from jax.experimental import pallas as pl
from jax.experimental.pallas import tpu as pltpu


# ----------------------------- in-kernel helpers -----------------------------

def _layernorm(x, g, b, eps=1e-5):
    # x: (N, D), g/b: (1, D); biased variance, matching torch.nn.LayerNorm.
    mu = jnp.mean(x, axis=-1, keepdims=True)
    var = jnp.mean((x - mu) ** 2, axis=-1, keepdims=True)
    return (x - mu) * lax.rsqrt(var + eps) * g + b


def _erf(x):
    # Abramowitz & Stegun 7.1.26 polynomial approximation (|err| < 1.5e-7).
    a1, a2, a3, a4, a5 = 0.254829592, -0.284496736, 1.421413741, -1.453152027, 1.061405429
    p = 0.3275911
    sgn = jnp.where(x >= 0.0, 1.0, -1.0)
    ax = jnp.abs(x)
    t = 1.0 / (1.0 + p * ax)
    poly = ((((a5 * t + a4) * t + a3) * t + a2) * t + a1) * t
    return sgn * (1.0 - poly * jnp.exp(-ax * ax))


def _gelu_exact(x):
    # Matches torch.nn.GELU() (approximate='none'): 0.5*x*(1+erf(x/sqrt(2)))
    # (kept exact for parity; tanh-GELU would change numerics).
    return 0.5 * x * (1.0 + _erf(x * 0.7071067811865476))


# --------------------------------- the kernel --------------------------------

def transformer_layers_kernel(x_ref,
                              ln1_g_ref, ln1_b_ref, w_qkv_ref, w_o_ref, b_o_ref,
                              ln2_g_ref, ln2_b_ref, w1_ref, b1_ref, w2_ref, b2_ref,
                              o_ref, x_carry, *, heads, dim_head):
    f32, bf16 = jnp.float32, jnp.bfloat16
    layer = pl.program_id(1)
    last_layer = pl.num_programs(1) - 1
    Bb, N, D = x_carry.shape
    inner = heads * dim_head
    scale = dim_head ** (-0.5)

    # Initialize the cross-layer activation carry once per batch block.
    @pl.when(layer == 0)
    def _():
        x_carry[...] = x_ref[...].astype(f32)

    # Current layer's parameters (leading depth axis already selected by the
    # BlockSpec index_map; [0] drops the size-1 block dim).
    ln1_g, ln1_b = ln1_g_ref[0], ln1_b_ref[0]
    ln2_g, ln2_b = ln2_g_ref[0], ln2_b_ref[0]
    w_qkv, w_o, b_o = w_qkv_ref[0], w_o_ref[0], b_o_ref[0]
    w1, b1, w2, b2 = w1_ref[0], b1_ref[0], w2_ref[0], b2_ref[0]

    # TODO(synk): the batch-block loop is trace-time unrolled; for large
    # per-core batches switch to lax.fori_loop (or a flattened (Bb*N, D) slab)
    # to bound live ranges / trace size.
    for b in range(Bb):
        x = x_carry[b]                                            # (N, D) f32

        # ---------------- PreNorm + Attention + residual ----------------
        h = _layernorm(x, ln1_g, ln1_b)                           # (N, D) f32
        # One wide MXU matmul for Q,K,V together (full D-deep contraction).
        qkv = jnp.dot(h.astype(bf16), w_qkv,
                      preferred_element_type=f32)                 # (N, 3*inner)

        q2 = (qkv[:, :inner] * scale).astype(bf16)                # scale folded into q
        k2 = qkv[:, inner:2 * inner].astype(bf16)
        v2 = qkv[:, 2 * inner:].astype(bf16)

        def heads_of(t):  # (N, inner) -> (heads, N, dh): lane slices + major stack
            return jnp.stack(
                [t[:, i * dim_head:(i + 1) * dim_head] for i in range(heads)],
                axis=0)

        qh, kh, vh = heads_of(q2), heads_of(k2), heads_of(v2)

        # Scores: K-transpose folded into the contraction (no explicit .T).
        s = jnp.einsum('hnd,hmd->hnm', qh, kh,
                       preferred_element_type=f32)                # (h, N, N)
        m = jnp.max(s, axis=-1, keepdims=True)
        e = jnp.exp(s - m)
        denom = jnp.sum(e, axis=-1, keepdims=True)
        p = e * pl.reciprocal(denom, approx=True)                 # divide on the EUP

        o_h = jnp.einsum('hnm,hmd->hnd', p.astype(bf16), vh,
                         preferred_element_type=f32)              # (h, N, dh)
        # Merge heads back to (N, inner) and do ONE full-depth output matmul.
        o_cat = jnp.concatenate([o_h[i] for i in range(heads)], axis=-1)
        attn_out = jnp.dot(o_cat.astype(bf16), w_o,
                           preferred_element_type=f32) + b_o      # (N, D)
        x1 = attn_out + x                                         # residual

        # ---------------- PreNorm + FeedForward + residual ----------------
        h2 = _layernorm(x1, ln2_g, ln2_b)
        f = jnp.dot(h2.astype(bf16), w1, preferred_element_type=f32) + b1
        f = _gelu_exact(f)
        f = jnp.dot(f.astype(bf16), w2, preferred_element_type=f32) + b2
        x_new = f + x1

        x_carry[b] = x_new

        @pl.when(layer == last_layer)
        def _():
            o_ref[b] = x_new.astype(o_ref.dtype)


# --------------------------------- wrapper ------------------------------------

def transformer_forward(x, all_layer_params, *, heads, dim_head, batch_block=None):
    """Full Transformer (all `depth` layers fused) over x: (B, N, D)."""
    B, N, D = x.shape
    depth = len(all_layer_params)
    bf16 = jnp.bfloat16

    if batch_block is None:
        batch_block = B
    assert B % batch_block == 0, "batch must be divisible by batch_block"

    # Stack per-layer params along a leading depth axis (layer grid axis selects
    # a slab); matmul weights in bf16 (MXU operands + half the HBM->VMEM bytes),
    # LN params / biases stay f32 (elementwise path).
    def stack(i, dtype=None):
        s = jnp.stack([lp[i] for lp in all_layer_params], axis=0)
        return s if dtype is None else s.astype(dtype)

    ln1_g, ln1_b = stack(0), stack(1)
    w_qkv = stack(2, bf16)          # (depth, D, 3*inner)
    w_o = stack(3, bf16)            # (depth, inner, D)
    b_o = stack(4)
    ln2_g, ln2_b = stack(5), stack(6)
    w1 = stack(7, bf16)             # (depth, D, mlp_dim)
    b1 = stack(8)
    w2 = stack(9, bf16)             # (depth, mlp_dim, D)
    b2 = stack(10)
    params = (ln1_g, ln1_b, w_qkv, w_o, b_o, ln2_g, ln2_b, w1, b1, w2, b2)

    def layer_spec(p):
        # One layer's slab per grid step; varies along the (inner) layer axis,
        # so default double-buffering prefetches layer l+1 under layer l.
        blk = (1,) + p.shape[1:]
        return pl.BlockSpec(blk, lambda b, l: (l,) + (0,) * (p.ndim - 1))

    kernel = functools.partial(transformer_layers_kernel,
                               heads=heads, dim_head=dim_head)

    grid = (B // batch_block, depth)
    x_spec = pl.BlockSpec((batch_block, N, D), lambda b, l: (b, 0, 0))
    out_spec = pl.BlockSpec((batch_block, N, D), lambda b, l: (b, 0, 0))

    return pl.pallas_call(
        kernel,
        out_shape=jax.ShapeDtypeStruct((B, N, D), x.dtype),
        grid_spec=pltpu.PrefetchScalarGridSpec(
            num_scalar_prefetch=0,
            grid=grid,
            in_specs=[x_spec] + [layer_spec(p) for p in params],
            out_specs=out_spec,
            scratch_shapes=[pltpu.VMEM((batch_block, N, D), jnp.float32)]),
        compiler_params=pltpu.CompilerParams(
            dimension_semantics=("parallel", "arbitrary"),
            vmem_limit_bytes=64 * 1024 * 1024),
    )(x, *params)


# ------------------------------ pure-JAX reference ----------------------------

def _layernorm_ref(x, g, b, eps=1e-5):
    mu = jnp.mean(x, axis=-1, keepdims=True)
    var = jnp.mean((x - mu) ** 2, axis=-1, keepdims=True)
    return (x - mu) / jnp.sqrt(var + eps) * g + b


def transformer_ref(x, all_layer_params, *, heads, dim_head):
    inner = heads * dim_head
    scale = dim_head ** (-0.5)
    for (ln1_g, ln1_b, w_qkv, w_o, b_o, ln2_g, ln2_b, w1, b1, w2, b2) in all_layer_params:
        B, N, D = x.shape
        h = _layernorm_ref(x, ln1_g[0], ln1_b[0])
        qkv = h @ w_qkv
        q, k, v = jnp.split(qkv, 3, axis=-1)
        split_h = lambda t: t.reshape(B, N, heads, dim_head).transpose(0, 2, 1, 3)
        q, k, v = map(split_h, (q, k, v))
        dots = jnp.einsum('bhnd,bhmd->bhnm', q, k) * scale
        attn = jax.nn.softmax(dots, axis=-1)
        out = jnp.einsum('bhnm,bhmd->bhnd', attn, v)
        out = out.transpose(0, 2, 1, 3).reshape(B, N, inner)
        out = out @ w_o + b_o[0]
        x = out + x
        h2 = _layernorm_ref(x, ln2_g[0], ln2_b[0])
        f = jax.nn.gelu(h2 @ w1 + b1[0], approximate=False)
        x = f @ w2 + b2[0] + x
    return x


# ------------------------------------ main -------------------------------------

def make_layer_params(key, dim, heads, dim_head, mlp_dim):
    inner = heads * dim_head
    ks = jax.random.split(key, 8)
    f32 = jnp.float32
    ln1_g = 1.0 + 0.1 * jax.random.normal(ks[0], (1, dim), f32)
    ln1_b = 0.1 * jax.random.normal(ks[1], (1, dim), f32)
    w_qkv = 0.05 * jax.random.normal(ks[2], (dim, 3 * inner), f32)   # to_qkv (no bias)
    w_o = 0.05 * jax.random.normal(ks[3], (inner, dim), f32)          # to_out Linear weight^T
    b_o = 0.1 * jax.random.normal(ks[4], (1, dim), f32)
    ln2_g = 1.0 + 0.1 * jax.random.normal(ks[5], (1, dim), f32)
    ln2_b = 0.1 * jax.random.normal(ks[6], (1, dim), f32)
    ks2 = jax.random.split(ks[7], 4)
    w1 = 0.05 * jax.random.normal(ks2[0], (dim, mlp_dim), f32)
    b1 = 0.1 * jax.random.normal(ks2[1], (1, mlp_dim), f32)
    w2 = 0.05 * jax.random.normal(ks2[2], (mlp_dim, dim), f32)
    b2 = 0.1 * jax.random.normal(ks2[3], (1, dim), f32)
    return (ln1_g, ln1_b, w_qkv, w_o, b_o, ln2_g, ln2_b, w1, b1, w2, b2)


if __name__ == "__main__":
    # Small shapes consistent with Transformer(dim, depth, heads, dim_head, mlp_dim)
    B, N = 2, 8
    dim, depth, heads, dim_head, mlp_dim = 32, 2, 4, 8, 64

    root = jax.random.PRNGKey(0)
    kx, kp = jax.random.split(root)
    x = jax.random.normal(kx, (B, N, dim), jnp.float32)

    layer_keys = jax.random.split(kp, depth)
    all_params = [make_layer_params(k, dim, heads, dim_head, mlp_dim) for k in layer_keys]

    out = transformer_forward(x, all_params, heads=heads, dim_head=dim_head)
    out = jax.block_until_ready(out)

    ref = transformer_ref(x, all_params, heads=heads, dim_head=dim_head)
    ref = jax.block_until_ready(ref)

    assert out.shape == (B, N, dim)
    # bf16 MXU operands (f32 accumulation) + approx reciprocal -> looser tolerance
    # than the pure-f32 reference.
    max_err = float(jnp.max(jnp.abs(out - ref)))
    assert jnp.allclose(out, ref, atol=2e-2, rtol=2e-2), max_err

    print("KERNEL_OK")
</pallas_src>

<mosaic_0001>
module attributes {stable_mosaic.version = 11 : i64} {
  func.func @transformer_layers_kernel(%arg0: i32, %arg1: i32, %arg2: memref<2x8x32xf32, #tpu.memory_space<vmem>>, %arg3: memref<1x1x32xf32, #tpu.memory_space<vmem>>, %arg4: memref<1x1x32xf32, #tpu.memory_space<vmem>>, %arg5: memref<1x32x96xbf16, #tpu.memory_space<vmem>>, %arg6: memref<1x32x32xbf16, #tpu.memory_space<vmem>>, %arg7: memref<1x1x32xf32, #tpu.memory_space<vmem>>, %arg8: memref<1x1x32xf32, #tpu.memory_space<vmem>>, %arg9: memref<1x1x32xf32, #tpu.memory_space<vmem>>, %arg10: memref<1x32x64xbf16, #tpu.memory_space<vmem>>, %arg11: memref<1x1x64xf32, #tpu.memory_space<vmem>>, %arg12: memref<1x64x32xbf16, #tpu.memory_space<vmem>>, %arg13: memref<1x1x32xf32, #tpu.memory_space<vmem>>, %arg14: memref<2x8x32xf32, #tpu.memory_space<vmem>>, %arg15: memref<2x8x32xf32, #tpu.memory_space<vmem>>) attributes {dimension_semantics = [#tpu.dimension_semantics<parallel>, #tpu.dimension_semantics<arbitrary>], iteration_bounds = array<i64: 1, 2>, scalar_prefetch = 0 : i64, scratch_operands = 1 : i64, tpu.core_type = #tpu.core_type<tc>, window_params = [{transform_indices = @transform_0, window_bounds = array<i64: 2, 8, 32>}, {transform_indices = @transform_1, window_bounds = array<i64: 1, 1, 32>}, {transform_indices = @transform_2, window_bounds = array<i64: 1, 1, 32>}, {transform_indices = @transform_3, window_bounds = array<i64: 1, 32, 96>}, {transform_indices = @transform_4, window_bounds = array<i64: 1, 32, 32>}, {transform_indices = @transform_5, window_bounds = array<i64: 1, 1, 32>}, {transform_indices = @transform_6, window_bounds = array<i64: 1, 1, 32>}, {transform_indices = @transform_7, window_bounds = array<i64: 1, 1, 32>}, {transform_indices = @transform_8, window_bounds = array<i64: 1, 32, 64>}, {transform_indices = @transform_9, window_bounds = array<i64: 1, 1, 64>}, {transform_indices = @transform_10, window_bounds = array<i64: 1, 64, 32>}, {transform_indices = @transform_11, window_bounds = array<i64: 1, 1, 32>}, {transform_indices = @transform_12, window_bounds = array<i64: 2, 8, 32>}]} {
    %c0_i32 = arith.constant 0 : i32
    %0 = arith.cmpi eq, %arg1, %c0_i32 : i32
    %1 = arith.extui %0 : i1 to i32
    %c0_i32_0 = arith.constant 0 : i32
    %2 = arith.cmpi ne, %1, %c0_i32_0 : i32
    scf.if %2 {
      %c0_116 = arith.constant 0 : index
      %c0_117 = arith.constant 0 : index
      %c0_118 = arith.constant 0 : index
      %357 = vector.load %arg2[%c0_116, %c0_117, %c0_118] : memref<2x8x32xf32, #tpu.memory_space<vmem>>, vector<2x8x32xf32>
      %c0_119 = arith.constant 0 : index
      %c0_120 = arith.constant 0 : index
      %c0_121 = arith.constant 0 : index
      %358 = vector.load %arg15[%c0_119, %c0_120, %c0_121] : memref<2x8x32xf32, #tpu.memory_space<vmem>>, vector<2x8x32xf32>
      tpu.vector_store %arg15[%c0_119, %c0_120, %c0_121], %357 {strides = array<i32>} : memref<2x8x32xf32, #tpu.memory_space<vmem>>, vector<2x8x32xf32>,
    } else {
    }
    %c0 = arith.constant 0 : index
    %c0_1 = arith.constant 0 : index
    %c0_2 = arith.constant 0 : index
    %3 = vector.load %arg3[%c0, %c0_1, %c0_2] : memref<1x1x32xf32, #tpu.memory_space<vmem>>, vector<1x1x32xf32>
    %4 = vector.shape_cast %3 : vector<1x1x32xf32> to vector<1x32xf32>
    %c0_3 = arith.constant 0 : index
    %c0_4 = arith.constant 0 : index
    %c0_5 = arith.constant 0 : index
    %5 = vector.load %arg4[%c0_3, %c0_4, %c0_5] : memref<1x1x32xf32, #tpu.memory_space<vmem>>, vector<1x1x32xf32>
    %6 = vector.shape_cast %5 : vector<1x1x32xf32> to vector<1x32xf32>
    %c0_6 = arith.constant 0 : index
    %c0_7 = arith.constant 0 : index
    %c0_8 = arith.constant 0 : index
    %7 = vector.load %arg8[%c0_6, %c0_7, %c0_8] : memref<1x1x32xf32, #tpu.memory_space<vmem>>, vector<1x1x32xf32>
    %8 = vector.shape_cast %7 : vector<1x1x32xf32> to vector<1x32xf32>
    %c0_9 = arith.constant 0 : index
    %c0_10 = arith.constant 0 : index
    %c0_11 = arith.constant 0 : index
    %9 = vector.load %arg9[%c0_9, %c0_10, %c0_11] : memref<1x1x32xf32, #tpu.memory_space<vmem>>, vector<1x1x32xf32>
    %10 = vector.shape_cast %9 : vector<1x1x32xf32> to vector<1x32xf32>
    %c0_12 = arith.constant 0 : index
    %c0_13 = arith.constant 0 : index
    %c0_14 = arith.constant 0 : index
    %11 = vector.load %arg5[%c0_12, %c0_13, %c0_14] : memref<1x32x96xbf16, #tpu.memory_space<vmem>>, vector<1x32x96xbf16>
    %12 = vector.shape_cast %11 : vector<1x32x96xbf16> to vector<32x96xbf16>
    %c0_15 = arith.constant 0 : index
    %c0_16 = arith.constant 0 : index
    %c0_17 = arith.constant 0 : index
    %13 = vector.load %arg6[%c0_15, %c0_16, %c0_17] : memref<1x32x32xbf16, #tpu.memory_space<vmem>>, vector<1x32x32xbf16>
    %14 = vector.shape_cast %13 : vector<1x32x32xbf16> to vector<32x32xbf16>
    %c0_18 = arith.constant 0 : index
    %c0_19 = arith.constant 0 : index
    %c0_20 = arith.constant 0 : index
    %15 = vector.load %arg7[%c0_18, %c0_19, %c0_20] : memref<1x1x32xf32, #tpu.memory_space<vmem>>, vector<1x1x32xf32>
    %16 = vector.shape_cast %15 : vector<1x1x32xf32> to vector<1x32xf32>
    %c0_21 = arith.constant 0 : index
    %c0_22 = arith.constant 0 : index
    %c0_23 = arith.constant 0 : index
    %17 = vector.load %arg10[%c0_21, %c0_22, %c0_23] : memref<1x32x64xbf16, #tpu.memory_space<vmem>>, vector<1x32x64xbf16>
    %18 = vector.shape_cast %17 : vector<1x32x64xbf16> to vector<32x64xbf16>
    %c0_24 = arith.constant 0 : index
    %c0_25 = arith.constant 0 : index
    %c0_26 = arith.constant 0 : index
    %19 = vector.load %arg11[%c0_24, %c0_25, %c0_26] : memref<1x1x64xf32, #tpu.memory_space<vmem>>, vector<1x1x64xf32>
    %20 = vector.shape_cast %19 : vector<1x1x64xf32> to vector<1x64xf32>
    %c0_27 = arith.constant 0 : index
    %c0_28 = arith.constant 0 : index
    %c0_29 = arith.constant 0 : index
    %21 = vector.load %arg12[%c0_27, %c0_28, %c0_29] : memref<1x64x32xbf16, #tpu.memory_space<vmem>>, vector<1x64x32xbf16>
    %22 = vector.shape_cast %21 : vector<1x64x32xbf16> to vector<64x32xbf16>
    %c0_30 = arith.constant 0 : index
    %c0_31 = arith.constant 0 : index
    %c0_32 = arith.constant 0 : index
    %23 = vector.load %arg13[%c0_30, %c0_31, %c0_32] : memref<1x1x32xf32, #tpu.memory_space<vmem>>, vector<1x1x32xf32>
    %24 = vector.shape_cast %23 : vector<1x1x32xf32> to vector<1x32xf32>
    %c0_33 = arith.constant 0 : index
    %c0_34 = arith.constant 0 : index
    %c0_35 = arith.constant 0 : index
    %25 = vector.load %arg15[%c0_33, %c0_34, %c0_35] : memref<2x8x32xf32, #tpu.memory_space<vmem>>, vector<1x8x32xf32>
    %26 = vector.shape_cast %25 : vector<1x8x32xf32> to vector<8x32xf32>
    %cst = arith.constant dense<0.000000e+00> : vector<8xf32>
    %27 = vector.multi_reduction <add>, %26, %cst [1] : vector<8x32xf32> to vector<8xf32>
    %28 = vector.shape_cast %27 : vector<8xf32> to vector<8x1xf32>
    %cst_36 = arith.constant 3.200000e+01 : f32
    %29 = vector.broadcast %cst_36 : f32 to vector<8x1xf32>
    %30 = arith.divf %28, %29 : vector<8x1xf32>
    %31 = vector.broadcast %30 : vector<8x1xf32> to vector<8x32xf32>
    %32 = arith.subf %26, %31 : vector<8x32xf32>
    %33 = arith.mulf %32, %32 : vector<8x32xf32>
    %cst_37 = arith.constant dense<0.000000e+00> : vector<8xf32>
    %34 = vector.multi_reduction <add>, %33, %cst_37 [1] : vector<8x32xf32> to vector<8xf32>
    %35 = vector.shape_cast %34 : vector<8xf32> to vector<8x1xf32>
    %cst_38 = arith.constant 3.200000e+01 : f32
    %36 = vector.broadcast %cst_38 : f32 to vector<8x1xf32>
    %37 = arith.divf %35, %36 : vector<8x1xf32>
    %38 = vector.broadcast %30 : vector<8x1xf32> to vector<8x32xf32>
    %39 = arith.subf %26, %38 : vector<8x32xf32>
    %cst_39 = arith.constant 9.99999974E-6 : f32
    %40 = vector.broadcast %cst_39 : f32 to vector<8x1xf32>
    %41 = arith.addf %37, %40 : vector<8x1xf32>
    %42 = math.rsqrt %41 : vector<8x1xf32>
    %43 = vector.broadcast %42 : vector<8x1xf32> to vector<8x32xf32>
    %44 = arith.mulf %39, %43 : vector<8x32xf32>
    %45 = vector.broadcast %4 : vector<1x32xf32> to vector<8x32xf32>
    %46 = arith.mulf %44, %45 : vector<8x32xf32>
    %47 = vector.broadcast %6 : vector<1x32xf32> to vector<8x32xf32>
    %48 = arith.addf %46, %47 : vector<8x32xf32>
    %49 = arith.truncf %48 : vector<8x32xf32> to vector<8x32xbf16>
    %cst_40 = arith.constant dense<0.000000e+00> : vector<8x96xf32>
    %50 = tpu.matmul %49, %12, %cst_40 {dimension_numbers = #tpu.dot_dimension_numbers<[1], [0], [0], [1], [0, 0, 1, 1], [], []>} : vector<8x32xbf16>, vector<32x96xbf16>, vector<8x96xf32> -> vector<8x96xf32>
    %51 = vector.extract_strided_slice %50 {offsets = [0, 0], sizes = [8, 32], strides = [1, 1]} : vector<8x96xf32> to vector<8x32xf32>
    %cst_41 = arith.constant 0.353553385 : f32
    %52 = vector.broadcast %cst_41 : f32 to vector<8x32xf32>
    %53 = arith.mulf %51, %52 : vector<8x32xf32>
    %54 = arith.truncf %53 : vector<8x32xf32> to vector<8x32xbf16>
    %55 = vector.extract_strided_slice %50 {offsets = [0, 32], sizes = [8, 32], strides = [1, 1]} : vector<8x96xf32> to vector<8x32xf32>
    %56 = arith.truncf %55 : vector<8x32xf32> to vector<8x32xbf16>
    %57 = vector.extract_strided_slice %50 {offsets = [0, 64], sizes = [8, 32], strides = [1, 1]} : vector<8x96xf32> to vector<8x32xf32>
    %58 = arith.truncf %57 : vector<8x32xf32> to vector<8x32xbf16>
    %59 = vector.extract_strided_slice %54 {offsets = [0, 0], sizes = [8, 8], strides = [1, 1]} : vector<8x32xbf16> to vector<8x8xbf16>
    %60 = vector.extract_strided_slice %54 {offsets = [0, 8], sizes = [8, 8], strides = [1, 1]} : vector<8x32xbf16> to vector<8x8xbf16>
    %61 = vector.extract_strided_slice %54 {offsets = [0, 16], sizes = [8, 8], strides = [1, 1]} : vector<8x32xbf16> to vector<8x8xbf16>
    %62 = vector.extract_strided_slice %54 {offsets = [0, 24], sizes = [8, 8], strides = [1, 1]} : vector<8x32xbf16> to vector<8x8xbf16>
    %63 = vector.shape_cast %59 : vector<8x8xbf16> to vector<1x8x8xbf16>
    %64 = vector.shape_cast %60 : vector<8x8xbf16> to vector<1x8x8xbf16>
    %65 = vector.shape_cast %61 : vector<8x8xbf16> to vector<1x8x8xbf16>
    %66 = vector.shape_cast %62 : vector<8x8xbf16> to vector<1x8x8xbf16>
    %67 = tpu.concatenate %63, %64, %65, %66 in 0 : vector<1x8x8xbf16>, vector<1x8x8xbf16>, vector<1x8x8xbf16>, vector<1x8x8xbf16> -> vector<4x8x8xbf16>
    %68 = vector.extract_strided_slice %56 {offsets = [0, 0], sizes = [8, 8], strides = [1, 1]} : vector<8x32xbf16> to vector<8x8xbf16>
    %69 = vector.extract_strided_slice %56 {offsets = [0, 8], sizes = [8, 8], strides = [1, 1]} : vector<8x32xbf16> to vector<8x8xbf16>
    %70 = vector.extract_strided_slice %56 {offsets = [0, 16], sizes = [8, 8], strides = [1, 1]} : vector<8x32xbf16> to vector<8x8xbf16>
    %71 = vector.extract_strided_slice %56 {offsets = [0, 24], sizes = [8, 8], strides = [1, 1]} : vector<8x32xbf16> to vector<8x8xbf16>
    %72 = vector.shape_cast %68 : vector<8x8xbf16> to vector<1x8x8xbf16>
    %73 = vector.shape_cast %69 : vector<8x8xbf16> to vector<1x8x8xbf16>
    %74 = vector.shape_cast %70 : vector<8x8xbf16> to vector<1x8x8xbf16>
    %75 = vector.shape_cast %71 : vector<8x8xbf16> to vector<1x8x8xbf16>
    %76 = tpu.concatenate %72, %73, %74, %75 in 0 : vector<1x8x8xbf16>, vector<1x8x8xbf16>, vector<1x8x8xbf16>, vector<1x8x8xbf16> -> vector<4x8x8xbf16>
    %77 = vector.extract_strided_slice %58 {offsets = [0, 0], sizes = [8, 8], strides = [1, 1]} : vector<8x32xbf16> to vector<8x8xbf16>
    %78 = vector.extract_strided_slice %58 {offsets = [0, 8], sizes = [8, 8], strides = [1, 1]} : vector<8x32xbf16> to vector<8x8xbf16>
    %79 = vector.extract_strided_slice %58 {offsets = [0, 16], sizes = [8, 8], strides = [1, 1]} : vector<8x32xbf16> to vector<8x8xbf16>
    %80 = vector.extract_strided_slice %58 {offsets = [0, 24], sizes = [8, 8], strides = [1, 1]} : vector<8x32xbf16> to vector<8x8xbf16>
    %81 = vector.shape_cast %77 : vector<8x8xbf16> to vector<1x8x8xbf16>
    %82 = vector.shape_cast %78 : vector<8x8xbf16> to vector<1x8x8xbf16>
    %83 = vector.shape_cast %79 : vector<8x8xbf16> to vector<1x8x8xbf16>
    %84 = vector.shape_cast %80 : vector<8x8xbf16> to vector<1x8x8xbf16>
    %85 = tpu.concatenate %81, %82, %83, %84 in 0 : vector<1x8x8xbf16>, vector<1x8x8xbf16>, vector<1x8x8xbf16>, vector<1x8x8xbf16> -> vector<4x8x8xbf16>
    "tpu.trace_start"() <{level = 10 : i32, message = "hnd,hmd->hnm"}> : () -> ()
    %cst_42 = arith.constant dense<0.000000e+00> : vector<4x8x8xf32>
    %86 = tpu.matmul %67, %76, %cst_42 {dimension_numbers = #tpu.dot_dimension_numbers<[2], [2], [1], [1], [0, 0, 0, 1, 1, 1], [0], [0]>} : vector<4x8x8xbf16>, vector<4x8x8xbf16>, vector<4x8x8xf32> -> vector<4x8x8xf32>
    "tpu.trace_stop"() : () -> ()
    %cst_43 = arith.constant dense<0xFF800000> : vector<4x8xf32>
    %87 = vector.multi_reduction <maximumf>, %86, %cst_43 [2] : vector<4x8x8xf32> to vector<4x8xf32>
    %88 = vector.shape_cast %87 : vector<4x8xf32> to vector<4x8x1xf32>
    %89 = vector.broadcast %88 : vector<4x8x1xf32> to vector<4x8x8xf32>
    %90 = arith.subf %86, %89 : vector<4x8x8xf32>
    %91 = math.exp %90 : vector<4x8x8xf32>
    %cst_44 = arith.constant dense<0.000000e+00> : vector<4x8xf32>
    %92 = vector.multi_reduction <add>, %91, %cst_44 [2] : vector<4x8x8xf32> to vector<4x8xf32>
    %93 = vector.shape_cast %92 : vector<4x8xf32> to vector<4x8x1xf32>
    %94 = tpu.reciprocal %93 {approx = true} : vector<4x8x1xf32> -> vector<4x8x1xf32>
    %95 = vector.broadcast %94 : vector<4x8x1xf32> to vector<4x8x8xf32>
    %96 = arith.mulf %91, %95 : vector<4x8x8xf32>
    %97 = arith.truncf %96 : vector<4x8x8xf32> to vector<4x8x8xbf16>
    "tpu.trace_start"() <{level = 10 : i32, message = "hnm,hmd->hnd"}> : () -> ()
    %cst_45 = arith.constant dense<0.000000e+00> : vector<4x8x8xf32>
    %98 = tpu.matmul %97, %85, %cst_45 {dimension_numbers = #tpu.dot_dimension_numbers<[2], [1], [1], [2], [0, 0, 0, 1, 1, 2], [0], [0]>} : vector<4x8x8xbf16>, vector<4x8x8xbf16>, vector<4x8x8xf32> -> vector<4x8x8xf32>
    "tpu.trace_stop"() : () -> ()
    %99 = vector.extract_strided_slice %98 {offsets = [0, 0, 0], sizes = [1, 8, 8], strides = [1, 1, 1]} : vector<4x8x8xf32> to vector<1x8x8xf32>
    %100 = vector.shape_cast %99 : vector<1x8x8xf32> to vector<8x8xf32>
    %101 = vector.extract_strided_slice %98 {offsets = [1, 0, 0], sizes = [1, 8, 8], strides = [1, 1, 1]} : vector<4x8x8xf32> to vector<1x8x8xf32>
    %102 = vector.shape_cast %101 : vector<1x8x8xf32> to vector<8x8xf32>
    %103 = vector.extract_strided_slice %98 {offsets = [2, 0, 0], sizes = [1, 8, 8], strides = [1, 1, 1]} : vector<4x8x8xf32> to vector<1x8x8xf32>
    %104 = vector.shape_cast %103 : vector<1x8x8xf32> to vector<8x8xf32>
    %105 = vector.extract_strided_slice %98 {offsets = [3, 0, 0], sizes = [1, 8, 8], strides = [1, 1, 1]} : vector<4x8x8xf32> to vector<1x8x8xf32>
    %106 = vector.shape_cast %105 : vector<1x8x8xf32> to vector<8x8xf32>
    %107 = tpu.concatenate %100, %102, %104, %106 in 1 : vector<8x8xf32>, vector<8x8xf32>, vector<8x8xf32>, vector<8x8xf32> -> vector<8x32xf32>
    %108 = arith.truncf %107 : vector<8x32xf32> to vector<8x32xbf16>
    %cst_46 = arith.constant dense<0.000000e+00> : vector<8x32xf32>
    %109 = tpu.matmul %108, %14, %cst_46 {dimension_numbers = #tpu.dot_dimension_numbers<[1], [0], [0], [1], [0, 0, 1, 1], [], []>} : vector<8x32xbf16>, vector<32x32xbf16>, vector<8x32xf32> -> vector<8x32xf32>
    %110 = vector.broadcast %16 : vector<1x32xf32> to vector<8x32xf32>
    %111 = arith.addf %109, %110 : vector<8x32xf32>
    %112 = arith.addf %111, %26 : vector<8x32xf32>
    %cst_47 = arith.constant dense<0.000000e+00> : vector<8xf32>
    %113 = vector.multi_reduction <add>, %112, %cst_47 [1] : vector<8x32xf32> to vector<8xf32>
    %114 = vector.shape_cast %113 : vector<8xf32> to vector<8x1xf32>
    %cst_48 = arith.constant 3.200000e+01 : f32
    %115 = vector.broadcast %cst_48 : f32 to vector<8x1xf32>
    %116 = arith.divf %114, %115 : vector<8x1xf32>
    %117 = vector.broadcast %116 : vector<8x1xf32> to vector<8x32xf32>
    %118 = arith.subf %112, %117 : vector<8x32xf32>
    %119 = arith.mulf %118, %118 : vector<8x32xf32>
    %cst_49 = arith.constant dense<0.000000e+00> : vector<8xf32>
    %120 = vector.multi_reduction <add>, %119, %cst_49 [1] : vector<8x32xf32> to vector<8xf32>
    %121 = vector.shape_cast %120 : vector<8xf32> to vector<8x1xf32>
    %cst_50 = arith.constant 3.200000e+01 : f32
    %122 = vector.broadcast %cst_50 : f32 to vector<8x1xf32>
    %123 = arith.divf %121, %122 : vector<8x1xf32>
    %124 = vector.broadcast %116 : vector<8x1xf32> to vector<8x32xf32>
    %125 = arith.subf %112, %124 : vector<8x32xf32>
    %cst_51 = arith.constant 9.99999974E-6 : f32
    %126 = vector.broadcast %cst_51 : f32 to vector<8x1xf32>
    %127 = arith.addf %123, %126 : vector<8x1xf32>
    %128 = math.rsqrt %127 : vector<8x1xf32>
    %129 = vector.broadcast %128 : vector<8x1xf32> to vector<8x32xf32>
    %130 = arith.mulf %125, %129 : vector<8x32xf32>
    %131 = vector.broadcast %8 : vector<1x32xf32> to vector<8x32xf32>
    %132 = arith.mulf %130, %131 : vector<8x32xf32>
    %133 = vector.broadcast %10 : vector<1x32xf32> to vector<8x32xf32>
    %134 = arith.addf %132, %133 : vector<8x32xf32>
    %135 = arith.truncf %134 : vector<8x32xf32> to vector<8x32xbf16>
    %cst_52 = arith.constant dense<0.000000e+00> : vector<8x64xf32>
    %136 = tpu.matmul %135, %18, %cst_52 {dimension_numbers = #tpu.dot_dimension_numbers<[1], [0], [0], [1], [0, 0, 1, 1], [], []>} : vector<8x32xbf16>, vector<32x64xbf16>, vector<8x64xf32> -> vector<8x64xf32>
    %137 = vector.broadcast %20 : vector<1x64xf32> to vector<8x64xf32>
    %138 = arith.addf %136, %137 : vector<8x64xf32>
    %cst_53 = arith.constant 5.000000e-01 : f32
    %139 = vector.broadcast %cst_53 : f32 to vector<8x64xf32>
    %140 = arith.mulf %139, %138 : vector<8x64xf32>
    %cst_54 = arith.constant 0.707106769 : f32
    %141 = vector.broadcast %cst_54 : f32 to vector<8x64xf32>
    %142 = arith.mulf %138, %141 : vector<8x64xf32>
    %cst_55 = arith.constant 0.000000e+00 : f32
    %143 = vector.broadcast %cst_55 : f32 to vector<8x64xf32>
    %144 = arith.cmpf oge, %142, %143 : vector<8x64xf32>
    %cst_56 = arith.constant 1.000000e+00 : f32
    %cst_57 = arith.constant -1.000000e+00 : f32
    %145 = vector.broadcast %cst_56 : f32 to vector<8x64xf32>
    %146 = vector.broadcast %cst_57 : f32 to vector<8x64xf32>
    %147 = arith.select %144, %145, %146 : vector<8x64xi1>, vector<8x64xf32>
    %148 = math.absf %142 : vector<8x64xf32>
    %cst_58 = arith.constant 0.327591091 : f32
    %149 = vector.broadcast %cst_58 : f32 to vector<8x64xf32>
    %150 = arith.mulf %149, %148 : vector<8x64xf32>
    %cst_59 = arith.constant 1.000000e+00 : f32
    %151 = vector.broadcast %cst_59 : f32 to vector<8x64xf32>
    %152 = arith.addf %151, %150 : vector<8x64xf32>
    %cst_60 = arith.constant 1.000000e+00 : f32
    %153 = vector.broadcast %cst_60 : f32 to vector<8x64xf32>
    %154 = arith.divf %153, %152 : vector<8x64xf32>
    %cst_61 = arith.constant 1.06140542 : f32
    %155 = vector.broadcast %cst_61 : f32 to vector<8x64xf32>
    %156 = arith.mulf %155, %154 : vector<8x64xf32>
    %cst_62 = arith.constant -1.45315206 : f32
    %157 = vector.broadcast %cst_62 : f32 to vector<8x64xf32>
    %158 = arith.addf %156, %157 : vector<8x64xf32>
    %159 = arith.mulf %158, %154 : vector<8x64xf32>
    %cst_63 = arith.constant 1.42141378 : f32
    %160 = vector.broadcast %cst_63 : f32 to vector<8x64xf32>
    %161 = arith.addf %159, %160 : vector<8x64xf32>
    %162 = arith.mulf %161, %154 : vector<8x64xf32>
    %cst_64 = arith.constant -0.284496725 : f32
    %163 = vector.broadcast %cst_64 : f32 to vector<8x64xf32>
    %164 = arith.addf %162, %163 : vector<8x64xf32>
    %165 = arith.mulf %164, %154 : vector<8x64xf32>
    %cst_65 = arith.constant 0.254829586 : f32
    %166 = vector.broadcast %cst_65 : f32 to vector<8x64xf32>
    %167 = arith.addf %165, %166 : vector<8x64xf32>
    %168 = arith.mulf %167, %154 : vector<8x64xf32>
    %cst_66 = arith.constant 0.000000e+00 : f32
    %169 = vector.broadcast %cst_66 : f32 to vector<8x64xf32>
    %170 = arith.subf %169, %148 : vector<8x64xf32>
    %171 = arith.mulf %170, %148 : vector<8x64xf32>
    %172 = math.exp %171 : vector<8x64xf32>
    %173 = arith.mulf %168, %172 : vector<8x64xf32>
    %cst_67 = arith.constant 1.000000e+00 : f32
    %174 = vector.broadcast %cst_67 : f32 to vector<8x64xf32>
    %175 = arith.subf %174, %173 : vector<8x64xf32>
    %176 = arith.mulf %147, %175 : vector<8x64xf32>
    %cst_68 = arith.constant 1.000000e+00 : f32
    %177 = vector.broadcast %cst_68 : f32 to vector<8x64xf32>
    %178 = arith.addf %177, %176 : vector<8x64xf32>
    %179 = arith.mulf %140, %178 : vector<8x64xf32>
    %180 = arith.truncf %179 : vector<8x64xf32> to vector<8x64xbf16>
    %cst_69 = arith.constant dense<0.000000e+00> : vector<8x32xf32>
    %181 = tpu.matmul %180, %22, %cst_69 {dimension_numbers = #tpu.dot_dimension_numbers<[1], [0], [0], [1], [0, 0, 1, 1], [], []>} : vector<8x64xbf16>, vector<64x32xbf16>, vector<8x32xf32> -> vector<8x32xf32>
    %182 = vector.broadcast %24 : vector<1x32xf32> to vector<8x32xf32>
    %183 = arith.addf %181, %182 : vector<8x32xf32>
    %184 = arith.addf %183, %112 : vector<8x32xf32>
    %c0_70 = arith.constant 0 : index
    %c0_71 = arith.constant 0 : index
    %c0_72 = arith.constant 0 : index
    %185 = vector.load %arg15[%c0_70, %c0_71, %c0_72] : memref<2x8x32xf32, #tpu.memory_space<vmem>>, vector<1x8x32xf32>
    %186 = vector.shape_cast %185 : vector<1x8x32xf32> to vector<8x32xf32>
    %187 = vector.shape_cast %184 : vector<8x32xf32> to vector<1x8x32xf32>
    tpu.vector_store %arg15[%c0_70, %c0_71, %c0_72], %187 {strides = array<i32>} : memref<2x8x32xf32, #tpu.memory_space<vmem>>, vector<1x8x32xf32>,
    %c1_i32 = arith.constant 1 : i32
    %188 = arith.cmpi eq, %arg1, %c1_i32 : i32
    %189 = arith.extui %188 : i1 to i32
    %c0_i32_73 = arith.constant 0 : i32
    %190 = arith.cmpi ne, %189, %c0_i32_73 : i32
    scf.if %190 {
      %c0_116 = arith.constant 0 : index
      %c0_117 = arith.constant 0 : index
      %c0_118 = arith.constant 0 : index
      %357 = vector.load %arg14[%c0_116, %c0_117, %c0_118] : memref<2x8x32xf32, #tpu.memory_space<vmem>>, vector<1x8x32xf32>
      %358 = vector.shape_cast %357 : vector<1x8x32xf32> to vector<8x32xf32>
      %359 = vector.shape_cast %184 : vector<8x32xf32> to vector<1x8x32xf32>
      tpu.vector_store %arg14[%c0_116, %c0_117, %c0_118], %359 {strides = array<i32>} : memref<2x8x32xf32, #tpu.memory_space<vmem>>, vector<1x8x32xf32>,
    } else {
    }
    %c1 = arith.constant 1 : index
    %c0_74 = arith.constant 0 : index
    %c0_75 = arith.constant 0 : index
    %191 = vector.load %arg15[%c1, %c0_74, %c0_75] : memref<2x8x32xf32, #tpu.memory_space<vmem>>, vector<1x8x32xf32>
    %192 = vector.shape_cast %191 : vector<1x8x32xf32> to vector<8x32xf32>
    %cst_76 = arith.constant dense<0.000000e+00> : vector<8xf32>
    %193 = vector.multi_reduction <add>, %192, %cst_76 [1] : vector<8x32xf32> to vector<8xf32>
    %194 = vector.shape_cast %193 : vector<8xf32> to vector<8x1xf32>
    %cst_77 = arith.constant 3.200000e+01 : f32
    %195 = vector.broadcast %cst_77 : f32 to vector<8x1xf32>
    %196 = arith.divf %194, %195 : vector<8x1xf32>
    %197 = vector.broadcast %196 : vector<8x1xf32> to vector<8x32xf32>
    %198 = arith.subf %192, %197 : vector<8x32xf32>
    %199 = arith.mulf %198, %198 : vector<8x32xf32>
    %cst_78 = arith.constant dense<0.000000e+00> : vector<8xf32>
    %200 = vector.multi_reduction <add>, %199, %cst_78 [1] : vector<8x32xf32> to vector<8xf32>
    %201 = vector.shape_cast %200 : vector<8xf32> to vector<8x1xf32>
    %cst_79 = arith.constant 3.200000e+01 : f32
    %202 = vector.broadcast %cst_79 : f32 to vector<8x1xf32>
    %203 = arith.divf %201, %202 : vector<8x1xf32>
    %204 = vector.broadcast %196 : vector<8x1xf32> to vector<8x32xf32>
    %205 = arith.subf %192, %204 : vector<8x32xf32>
    %cst_80 = arith.constant 9.99999974E-6 : f32
    %206 = vector.broadcast %cst_80 : f32 to vector<8x1xf32>
    %207 = arith.addf %203, %206 : vector<8x1xf32>
    %208 = math.rsqrt %207 : vector<8x1xf32>
    %209 = vector.broadcast %208 : vector<8x1xf32> to vector<8x32xf32>
    %210 = arith.mulf %205, %209 : vector<8x32xf32>
    %211 = vector.broadcast %4 : vector<1x32xf32> to vector<8x32xf32>
    %212 = arith.mulf %210, %211 : vector<8x32xf32>
    %213 = vector.broadcast %6 : vector<1x32xf32> to vector<8x32xf32>
    %214 = arith.addf %212, %213 : vector<8x32xf32>
    %215 = arith.truncf %214 : vector<8x32xf32> to vector<8x32xbf16>
    %cst_81 = arith.constant dense<0.000000e+00> : vector<8x96xf32>
    %216 = tpu.matmul %215, %12, %cst_81 {dimension_numbers = #tpu.dot_dimension_numbers<[1], [0], [0], [1], [0, 0, 1, 1], [], []>} : vector<8x32xbf16>, vector<32x96xbf16>, vector<8x96xf32> -> vector<8x96xf32>
    %217 = vector.extract_strided_slice %216 {offsets = [0, 0], sizes = [8, 32], strides = [1, 1]} : vector<8x96xf32> to vector<8x32xf32>
    %cst_82 = arith.constant 0.353553385 : f32
    %218 = vector.broadcast %cst_82 : f32 to vector<8x32xf32>
    %219 = arith.mulf %217, %218 : vector<8x32xf32>
    %220 = arith.truncf %219 : vector<8x32xf32> to vector<8x32xbf16>
    %221 = vector.extract_strided_slice %216 {offsets = [0, 32], sizes = [8, 32], strides = [1, 1]} : vector<8x96xf32> to vector<8x32xf32>
    %222 = arith.truncf %221 : vector<8x32xf32> to vector<8x32xbf16>
    %223 = vector.extract_strided_slice %216 {offsets = [0, 64], sizes = [8, 32], strides = [1, 1]} : vector<8x96xf32> to vector<8x32xf32>
    %224 = arith.truncf %223 : vector<8x32xf32> to vector<8x32xbf16>
    %225 = vector.extract_strided_slice %220 {offsets = [0, 0], sizes = [8, 8], strides = [1, 1]} : vector<8x32xbf16> to vector<8x8xbf16>
    %226 = vector.extract_strided_slice %220 {offsets = [0, 8], sizes = [8, 8], strides = [1, 1]} : vector<8x32xbf16> to vector<8x8xbf16>
    %227 = vector.extract_strided_slice %220 {offsets = [0, 16], sizes = [8, 8], strides = [1, 1]} : vector<8x32xbf16> to vector<8x8xbf16>
    %228 = vector.extract_strided_slice %220 {offsets = [0, 24], sizes = [8, 8], strides = [1, 1]} : vector<8x32xbf16> to vector<8x8xbf16>
    %229 = vector.shape_cast %225 : vector<8x8xbf16> to vector<1x8x8xbf16>
    %230 = vector.shape_cast %226 : vector<8x8xbf16> to vector<1x8x8xbf16>
    %231 = vector.shape_cast %227 : vector<8x8xbf16> to vector<1x8x8xbf16>
    %232 = vector.shape_cast %228 : vector<8x8xbf16> to vector<1x8x8xbf16>
    %233 = tpu.concatenate %229, %230, %231, %232 in 0 : vector<1x8x8xbf16>, vector<1x8x8xbf16>, vector<1x8x8xbf16>, vector<1x8x8xbf16> -> vector<4x8x8xbf16>
    %234 = vector.extract_strided_slice %222 {offsets = [0, 0], sizes = [8, 8], strides = [1, 1]} : vector<8x32xbf16> to vector<8x8xbf16>
    %235 = vector.extract_strided_slice %222 {offsets = [0, 8], sizes = [8, 8], strides = [1, 1]} : vector<8x32xbf16> to vector<8x8xbf16>
    %236 = vector.extract_strided_slice %222 {offsets = [0, 16], sizes = [8, 8], strides = [1, 1]} : vector<8x32xbf16> to vector<8x8xbf16>
    %237 = vector.extract_strided_slice %222 {offsets = [0, 24], sizes = [8, 8], strides = [1, 1]} : vector<8x32xbf16> to vector<8x8xbf16>
    %238 = vector.shape_cast %234 : vector<8x8xbf16> to vector<1x8x8xbf16>
    %239 = vector.shape_cast %235 : vector<8x8xbf16> to vector<1x8x8xbf16>
    %240 = vector.shape_cast %236 : vector<8x8xbf16> to vector<1x8x8xbf16>
    %241 = vector.shape_cast %237 : vector<8x8xbf16> to vector<1x8x8xbf16>
    %242 = tpu.concatenate %238, %239, %240, %241 in 0 : vector<1x8x8xbf16>, vector<1x8x8xbf16>, vector<1x8x8xbf16>, vector<1x8x8xbf16> -> vector<4x8x8xbf16>
    %243 = vector.extract_strided_slice %224 {offsets = [0, 0], sizes = [8, 8], strides = [1, 1]} : vector<8x32xbf16> to vector<8x8xbf16>
    %244 = vector.extract_strided_slice %224 {offsets = [0, 8], sizes = [8, 8], strides = [1, 1]} : vector<8x32xbf16> to vector<8x8xbf16>
    %245 = vector.extract_strided_slice %224 {offsets = [0, 16], sizes = [8, 8], strides = [1, 1]} : vector<8x32xbf16> to vector<8x8xbf16>
    %246 = vector.extract_strided_slice %224 {offsets = [0, 24], sizes = [8, 8], strides = [1, 1]} : vector<8x32xbf16> to vector<8x8xbf16>
    %247 = vector.shape_cast %243 : vector<8x8xbf16> to vector<1x8x8xbf16>
    %248 = vector.shape_cast %244 : vector<8x8xbf16> to vector<1x8x8xbf16>
    %249 = vector.shape_cast %245 : vector<8x8xbf16> to vector<1x8x8xbf16>
    %250 = vector.shape_cast %246 : vector<8x8xbf16> to vector<1x8x8xbf16>
    %251 = tpu.concatenate %247, %248, %249, %250 in 0 : vector<1x8x8xbf16>, vector<1x8x8xbf16>, vector<1x8x8xbf16>, vector<1x8x8xbf16> -> vector<4x8x8xbf16>
    "tpu.trace_start"() <{level = 10 : i32, message = "hnd,hmd->hnm"}> : () -> ()
    %cst_83 = arith.constant dense<0.000000e+00> : vector<4x8x8xf32>
    %252 = tpu.matmul %233, %242, %cst_83 {dimension_numbers = #tpu.dot_dimension_numbers<[2], [2], [1], [1], [0, 0, 0, 1, 1, 1], [0], [0]>} : vector<4x8x8xbf16>, vector<4x8x8xbf16>, vector<4x8x8xf32> -> vector<4x8x8xf32>
    "tpu.trace_stop"() : () -> ()
    %cst_84 = arith.constant dense<0xFF800000> : vector<4x8xf32>
    %253 = vector.multi_reduction <maximumf>, %252, %cst_84 [2] : vector<4x8x8xf32> to vector<4x8xf32>
    %254 = vector.shape_cast %253 : vector<4x8xf32> to vector<4x8x1xf32>
    %255 = vector.broadcast %254 : vector<4x8x1xf32> to vector<4x8x8xf32>
    %256 = arith.subf %252, %255 : vector<4x8x8xf32>
    %257 = math.exp %256 : vector<4x8x8xf32>
    %cst_85 = arith.constant dense<0.000000e+00> : vector<4x8xf32>
    %258 = vector.multi_reduction <add>, %257, %cst_85 [2] : vector<4x8x8xf32> to vector<4x8xf32>
    %259 = vector.shape_cast %258 : vector<4x8xf32> to vector<4x8x1xf32>
    %260 = tpu.reciprocal %259 {approx = true} : vector<4x8x1xf32> -> vector<4x8x1xf32>
    %261 = vector.broadcast %260 : vector<4x8x1xf32> to vector<4x8x8xf32>
    %262 = arith.mulf %257, %261 : vector<4x8x8xf32>
    %263 = arith.truncf %262 : vector<4x8x8xf32> to vector<4x8x8xbf16>
    "tpu.trace_start"() <{level = 10 : i32, message = "hnm,hmd->hnd"}> : () -> ()
    %cst_86 = arith.constant dense<0.000000e+00> : vector<4x8x8xf32>
    %264 = tpu.matmul %263, %251, %cst_86 {dimension_numbers = #tpu.dot_dimension_numbers<[2], [1], [1], [2], [0, 0, 0, 1, 1, 2], [0], [0]>} : vector<4x8x8xbf16>, vector<4x8x8xbf16>, vector<4x8x8xf32> -> vector<4x8x8xf32>
    "tpu.trace_stop"() : () -> ()
    %265 = vector.extract_strided_slice %264 {offsets = [0, 0, 0], sizes = [1, 8, 8], strides = [1, 1, 1]} : vector<4x8x8xf32> to vector<1x8x8xf32>
    %266 = vector.shape_cast %265 : vector<1x8x8xf32> to vector<8x8xf32>
    %267 = vector.extract_strided_slice %264 {offsets = [1, 0, 0], sizes = [1, 8, 8], strides = [1, 1, 1]} : vector<4x8x8xf32> to vector<1x8x8xf32>
    %268 = vector.shape_cast %267 : vector<1x8x8xf32> to vector<8x8xf32>
    %269 = vector.extract_strided_slice %264 {offsets = [2, 0, 0], sizes = [1, 8, 8], strides = [1, 1, 1]} : vector<4x8x8xf32> to vector<1x8x8xf32>
    %270 = vector.shape_cast %269 : vector<1x8x8xf32> to vector<8x8xf32>
    %271 = vector.extract_strided_slice %264 {offsets = [3, 0, 0], sizes = [1, 8, 8], strides = [1, 1, 1]} : vector<4x8x8xf32> to vector<1x8x8xf32>
    %272 = vector.shape_cast %271 : vector<1x8x8xf32> to vector<8x8xf32>
    %273 = tpu.concatenate %266, %268, %270, %272 in 1 : vector<8x8xf32>, vector<8x8xf32>, vector<8x8xf32>, vector<8x8xf32> -> vector<8x32xf32>
    %274 = arith.truncf %273 : vector<8x32xf32> to vector<8x32xbf16>
    %cst_87 = arith.constant dense<0.000000e+00> : vector<8x32xf32>
    %275 = tpu.matmul %274, %14, %cst_87 {dimension_numbers = #tpu.dot_dimension_numbers<[1], [0], [0], [1], [0, 0, 1, 1], [], []>} : vector<8x32xbf16>, vector<32x32xbf16>, vector<8x32xf32> -> vector<8x32xf32>
    %276 = vector.broadcast %16 : vector<1x32xf32> to vector<8x32xf32>
    %277 = arith.addf %275, %276 : vector<8x32xf32>
    %278 = arith.addf %277, %192 : vector<8x32xf32>
    %cst_88 = arith.constant dense<0.000000e+00> : vector<8xf32>
    %279 = vector.multi_reduction <add>, %278, %cst_88 [1] : vector<8x32xf32> to vector<8xf32>
    %280 = vector.shape_cast %279 : vector<8xf32> to vector<8x1xf32>
    %cst_89 = arith.constant 3.200000e+01 : f32
    %281 = vector.broadcast %cst_89 : f32 to vector<8x1xf32>
    %282 = arith.divf %280, %281 : vector<8x1xf32>
    %283 = vector.broadcast %282 : vector<8x1xf32> to vector<8x32xf32>
    %284 = arith.subf %278, %283 : vector<8x32xf32>
    %285 = arith.mulf %284, %284 : vector<8x32xf32>
    %cst_90 = arith.constant dense<0.000000e+00> : vector<8xf32>
    %286 = vector.multi_reduction <add>, %285, %cst_90 [1] : vector<8x32xf32> to vector<8xf32>
    %287 = vector.shape_cast %286 : vector<8xf32> to vector<8x1xf32>
    %cst_91 = arith.constant 3.200000e+01 : f32
    %288 = vector.broadcast %cst_91 : f32 to vector<8x1xf32>
    %289 = arith.divf %287, %288 : vector<8x1xf32>
    %290 = vector.broadcast %282 : vector<8x1xf32> to vector<8x32xf32>
    %291 = arith.subf %278, %290 : vector<8x32xf32>
    %cst_92 = arith.constant 9.99999974E-6 : f32
    %292 = vector.broadcast %cst_92 : f32 to vector<8x1xf32>
    %293 = arith.addf %289, %292 : vector<8x1xf32>
    %294 = math.rsqrt %293 : vector<8x1xf32>
    %295 = vector.broadcast %294 : vector<8x1xf32> to vector<8x32xf32>
    %296 = arith.mulf %291, %295 : vector<8x32xf32>
    %297 = vector.broadcast %8 : vector<1x32xf32> to vector<8x32xf32>
    %298 = arith.mulf %296, %297 : vector<8x32xf32>
    %299 = vector.broadcast %10 : vector<1x32xf32> to vector<8x32xf32>
    %300 = arith.addf %298, %299 : vector<8x32xf32>
    %301 = arith.truncf %300 : vector<8x32xf32> to vector<8x32xbf16>
    %cst_93 = arith.constant dense<0.000000e+00> : vector<8x64xf32>
    %302 = tpu.matmul %301, %18, %cst_93 {dimension_numbers = #tpu.dot_dimension_numbers<[1], [0], [0], [1], [0, 0, 1, 1], [], []>} : vector<8x32xbf16>, vector<32x64xbf16>, vector<8x64xf32> -> vector<8x64xf32>
    %303 = vector.broadcast %20 : vector<1x64xf32> to vector<8x64xf32>
    %304 = arith.addf %302, %303 : vector<8x64xf32>
    %cst_94 = arith.constant 5.000000e-01 : f32
    %305 = vector.broadcast %cst_94 : f32 to vector<8x64xf32>
    %306 = arith.mulf %305, %304 : vector<8x64xf32>
    %cst_95 = arith.constant 0.707106769 : f32
    %307 = vector.broadcast %cst_95 : f32 to vector<8x64xf32>
    %308 = arith.mulf %304, %307 : vector<8x64xf32>
    %cst_96 = arith.constant 0.000000e+00 : f32
    %309 = vector.broadcast %cst_96 : f32 to vector<8x64xf32>
    %310 = arith.cmpf oge, %308, %309 : vector<8x64xf32>
    %cst_97 = arith.constant 1.000000e+00 : f32
    %cst_98 = arith.constant -1.000000e+00 : f32
    %311 = vector.broadcast %cst_97 : f32 to vector<8x64xf32>
    %312 = vector.broadcast %cst_98 : f32 to vector<8x64xf32>
    %313 = arith.select %310, %311, %312 : vector<8x64xi1>, vector<8x64xf32>
    %314 = math.absf %308 : vector<8x64xf32>
    %cst_99 = arith.constant 0.327591091 : f32
    %315 = vector.broadcast %cst_99 : f32 to vector<8x64xf32>
    %316 = arith.mulf %315, %314 : vector<8x64xf32>
    %cst_100 = arith.constant 1.000000e+00 : f32
    %317 = vector.broadcast %cst_100 : f32 to vector<8x64xf32>
    %318 = arith.addf %317, %316 : vector<8x64xf32>
    %cst_101 = arith.constant 1.000000e+00 : f32
    %319 = vector.broadcast %cst_101 : f32 to vector<8x64xf32>
    %320 = arith.divf %319, %318 : vector<8x64xf32>
    %cst_102 = arith.constant 1.06140542 : f32
    %321 = vector.broadcast %cst_102 : f32 to vector<8x64xf32>
    %322 = arith.mulf %321, %320 : vector<8x64xf32>
    %cst_103 = arith.constant -1.45315206 : f32
    %323 = vector.broadcast %cst_103 : f32 to vector<8x64xf32>
    %324 = arith.addf %322, %323 : vector<8x64xf32>
    %325 = arith.mulf %324, %320 : vector<8x64xf32>
    %cst_104 = arith.constant 1.42141378 : f32
    %326 = vector.broadcast %cst_104 : f32 to vector<8x64xf32>
    %327 = arith.addf %325, %326 : vector<8x64xf32>
    %328 = arith.mulf %327, %320 : vector<8x64xf32>
    %cst_105 = arith.constant -0.284496725 : f32
    %329 = vector.broadcast %cst_105 : f32 to vector<8x64xf32>
    %330 = arith.addf %328, %329 : vector<8x64xf32>
    %331 = arith.mulf %330, %320 : vector<8x64xf32>
    %cst_106 = arith.constant 0.254829586 : f32
    %332 = vector.broadcast %cst_106 : f32 to vector<8x64xf32>
    %333 = arith.addf %331, %332 : vector<8x64xf32>
    %334 = arith.mulf %333, %320 : vector<8x64xf32>
    %cst_107 = arith.constant 0.000000e+00 : f32
    %335 = vector.broadcast %cst_107 : f32 to vector<8x64xf32>
    %336 = arith.subf %335, %314 : vector<8x64xf32>
    %337 = arith.mulf %336, %314 : vector<8x64xf32>
    %338 = math.exp %337 : vector<8x64xf32>
    %339 = arith.mulf %334, %338 : vector<8x64xf32>
    %cst_108 = arith.constant 1.000000e+00 : f32
    %340 = vector.broadcast %cst_108 : f32 to vector<8x64xf32>
    %341 = arith.subf %340, %339 : vector<8x64xf32>
    %342 = arith.mulf %313, %341 : vector<8x64xf32>
    %cst_109 = arith.constant 1.000000e+00 : f32
    %343 = vector.broadcast %cst_109 : f32 to vector<8x64xf32>
    %344 = arith.addf %343, %342 : vector<8x64xf32>
    %345 = arith.mulf %306, %344 : vector<8x64xf32>
    %346 = arith.truncf %345 : vector<8x64xf32> to vector<8x64xbf16>
    %cst_110 = arith.constant dense<0.000000e+00> : vector<8x32xf32>
    %347 = tpu.matmul %346, %22, %cst_110 {dimension_numbers = #tpu.dot_dimension_numbers<[1], [0], [0], [1], [0, 0, 1, 1], [], []>} : vector<8x64xbf16>, vector<64x32xbf16>, vector<8x32xf32> -> vector<8x32xf32>
    %348 = vector.broadcast %24 : vector<1x32xf32> to vector<8x32xf32>
    %349 = arith.addf %347, %348 : vector<8x32xf32>
    %350 = arith.addf %349, %278 : vector<8x32xf32>
    %c1_111 = arith.constant 1 : index
    %c0_112 = arith.constant 0 : index
    %c0_113 = arith.constant 0 : index
    %351 = vector.load %arg15[%c1_111, %c0_112, %c0_113] : memref<2x8x32xf32, #tpu.memory_space<vmem>>, vector<1x8x32xf32>
    %352 = vector.shape_cast %351 : vector<1x8x32xf32> to vector<8x32xf32>
    %353 = vector.shape_cast %350 : vector<8x32xf32> to vector<1x8x32xf32>
    tpu.vector_store %arg15[%c1_111, %c0_112, %c0_113], %353 {strides = array<i32>} : memref<2x8x32xf32, #tpu.memory_space<vmem>>, vector<1x8x32xf32>,
    %c1_i32_114 = arith.constant 1 : i32
    %354 = arith.cmpi eq, %arg1, %c1_i32_114 : i32
    %355 = arith.extui %354 : i1 to i32
    %c0_i32_115 = arith.constant 0 : i32
    %356 = arith.cmpi ne, %355, %c0_i32_115 : i32
    scf.if %356 {
      %c1_116 = arith.constant 1 : index
      %c0_117 = arith.constant 0 : index
      %c0_118 = arith.constant 0 : index
      %357 = vector.load %arg14[%c1_116, %c0_117, %c0_118] : memref<2x8x32xf32, #tpu.memory_space<vmem>>, vector<1x8x32xf32>
      %358 = vector.shape_cast %357 : vector<1x8x32xf32> to vector<8x32xf32>
      %359 = vector.shape_cast %350 : vector<8x32xf32> to vector<1x8x32xf32>
      tpu.vector_store %arg14[%c1_116, %c0_117, %c0_118], %359 {strides = array<i32>} : memref<2x8x32xf32, #tpu.memory_space<vmem>>, vector<1x8x32xf32>,
    } else {
    }
    return
  }
  func.func @transform_0(%arg0: i32, %arg1: i32) -> (i32, i32, i32) {
    %c0_i32 = arith.constant 0 : i32
    %c0_i32_0 = arith.constant 0 : i32
    %c0_i32_1 = arith.constant 0 : i32
    return %arg0, %c0_i32, %c0_i32_0 : i32, i32, i32
  }
  func.func @transform_1(%arg0: i32, %arg1: i32) -> (i32, i32, i32) {
    %c0_i32 = arith.constant 0 : i32
    %c0_i32_0 = arith.constant 0 : i32
    %c0_i32_1 = arith.constant 0 : i32
    return %arg1, %c0_i32, %c0_i32_0 : i32, i32, i32
  }
  func.func @transform_2(%arg0: i32, %arg1: i32) -> (i32, i32, i32) {
    %c0_i32 = arith.constant 0 : i32
    %c0_i32_0 = arith.constant 0 : i32
    %c0_i32_1 = arith.constant 0 : i32
    return %arg1, %c0_i32, %c0_i32_0 : i32, i32, i32
  }
  func.func @transform_3(%arg0: i32, %arg1: i32) -> (i32, i32, i32) {
    %c0_i32 = arith.constant 0 : i32
    %c0_i32_0 = arith.constant 0 : i32
    %c0_i32_1 = arith.constant 0 : i32
    return %arg1, %c0_i32, %c0_i32_0 : i32, i32, i32
  }
  func.func @transform_4(%arg0: i32, %arg1: i32) -> (i32, i32, i32) {
    %c0_i32 = arith.constant 0 : i32
    %c0_i32_0 = arith.constant 0 : i32
    %c0_i32_1 = arith.constant 0 : i32
    return %arg1, %c0_i32, %c0_i32_0 : i32, i32, i32
  }
  func.func @transform_5(%arg0: i32, %arg1: i32) -> (i32, i32, i32) {
    %c0_i32 = arith.constant 0 : i32
    %c0_i32_0 = arith.constant 0 : i32
    %c0_i32_1 = arith.constant 0 : i32
    return %arg1, %c0_i32, %c0_i32_0 : i32, i32, i32
  }
  func.func @transform_6(%arg0: i32, %arg1: i32) -> (i32, i32, i32) {
    %c0_i32 = arith.constant 0 : i32
    %c0_i32_0 = arith.constant 0 : i32
    %c0_i32_1 = arith.constant 0 : i32
    return %arg1, %c0_i32, %c0_i32_0 : i32, i32, i32
  }
  func.func @transform_7(%arg0: i32, %arg1: i32) -> (i32, i32, i32) {
    %c0_i32 = arith.constant 0 : i32
    %c0_i32_0 = arith.constant 0 : i32
    %c0_i32_1 = arith.constant 0 : i32
    return %arg1, %c0_i32, %c0_i32_0 : i32, i32, i32
  }
  func.func @transform_8(%arg0: i32, %arg1: i32) -> (i32, i32, i32) {
    %c0_i32 = arith.constant 0 : i32
    %c0_i32_0 = arith.constant 0 : i32
    %c0_i32_1 = arith.constant 0 : i32
    return %arg1, %c0_i32, %c0_i32_0 : i32, i32, i32
  }
  func.func @transform_9(%arg0: i32, %arg1: i32) -> (i32, i32, i32) {
    %c0_i32 = arith.constant 0 : i32
    %c0_i32_0 = arith.constant 0 : i32
    %c0_i32_1 = arith.constant 0 : i32
    return %arg1, %c0_i32, %c0_i32_0 : i32, i32, i32
  }
  func.func @transform_10(%arg0: i32, %arg1: i32) -> (i32, i32, i32) {
    %c0_i32 = arith.constant 0 : i32
    %c0_i32_0 = arith.constant 0 : i32
    %c0_i32_1 = arith.constant 0 : i32
    return %arg1, %c0_i32, %c0_i32_0 : i32, i32, i32
  }
  func.func @transform_11(%arg0: i32, %arg1: i32) -> (i32, i32, i32) {
    %c0_i32 = arith.constant 0 : i32
    %c0_i32_0 = arith.constant 0 : i32
    %c0_i32_1 = arith.constant 0 : i32
    return %arg1, %c0_i32, %c0_i32_0 : i32, i32, i32
  }
  func.func @transform_12(%arg0: i32, %arg1: i32) -> (i32, i32, i32) {
    %c0_i32 = arith.constant 0 : i32
    %c0_i32_0 = arith.constant 0 : i32
    %c0_i32_1 = arith.constant 0 : i32
    return %arg0, %c0_i32, %c0_i32_0 : i32, i32, i32
  }
}

</mosaic_0001>

<bundles_post_ra>
// kernel: tpu_custom_call.1
= control target key start
LH: loop header
LB: loop body
LE: loop exit
PB: predicated region body
PF: predicated region fallthrough
CT: control target
= control target key end

     0   :  { %s4602_s0 = inlined_call_operand.hbm [shape: f32[2,8,32], index: 0, kind: input, shape index: {}]   ;;  %s4603_s1 = inlined_call_operand.hbm [shape: f32[2,1,32], index: 1, kind: input, shape index: {}]   ;;  %s4604_s2 = inlined_call_operand.hbm [shape: f32[2,1,32], index: 2, kind: input, shape index: {}]   ;;  %s4605_s3 = inlined_call_operand.hbm [shape: bf16[2,32,96], index: 3, kind: input, shape index: {}]   ;;  %s4606_s4 = inlined_call_operand.hbm [shape: bf16[2,32,32], index: 4, kind: input, shape index: {}]   ;;  %s4607_s5 = inlined_call_operand.hbm [shape: f32[2,1,32], index: 5, kind: input, shape index: {}]   ;;  %s4608_s6 = inlined_call_operand.hbm [shape: f32[2,1,32], index: 6, kind: input, shape index: {}]   ;;  %s4609_s7 = inlined_call_operand.hbm [shape: f32[2,1,32], index: 7, kind: input, shape index: {}]   ;;  %s4610_s8 = inlined_call_operand.hbm [shape: bf16[2,32,64], index: 8, kind: input, shape index: {}]   ;;  %s4611_s9 = inlined_call_operand.hbm [shape: f32[2,1,64], index: 9, kind: input, shape index: {}]   ;;  %s4612_s10 = inlined_call_operand.hbm [shape: bf16[2,64,32], index: 10, kind: input, shape index: {}]   ;;  %s4613_s11 = inlined_call_operand.hbm [shape: f32[2,1,32], index: 11, kind: input, shape index: {}]   ;;  %s4614_s12 = inlined_call_operand.hbm [shape: f32[2,8,32], index: 12, kind: output, shape index: {}]  }
   0x1   :  { %4640 = sst [smem:[#allocation38_spill]] %s4602_s0 }
   0x2   :  { %4641 = sst [smem:[#allocation39_spill]] %s4603_s1 }
   0x3   :  { %4642 = sst [smem:[#allocation40_spill]] %s4604_s2 }
   0x4   :  { %4643 = sst [smem:[#allocation41_spill]] %s4605_s3 }
   0x5   :  { %4644 = sst [smem:[#allocation42_spill]] %s4607_s5 }
   0x6   :  { %4645 = sst [smem:[#allocation43_spill]] %s4609_s7 }
   0x7   :  { %4646 = sst [smem:[#allocation44_spill]] %s4611_s9 }
   0x8   :  { %4647 = sst [smem:[#allocation45_spill]] %s4612_s10 }
   0x9   :  { %4648 = sst [smem:[#allocation46_spill]] %s4613_s11 }
   0xa   :  { %4649 = sst [smem:[#allocation47_spill]] %s4614_s12 }
   0xb   :  { %17 = vsyncpa [#allocation4], 0 }
   0xc   :  { %18 = vsyncpa [#allocation7], 0 }
   0xd   :  { %20 = vsyncpa [#allocation7 + $0x1], 0 }
   0xe   :  { %21 = vsyncpa [#allocation10], 0 }
   0xf   :  { %23 = vsyncpa [#allocation10 + $0x1], 0 }
  0x10   :  { %24 = vsyncpa [#allocation13], 0 }
  0x11   :  { %26 = vsyncpa [#allocation13 + $0x1], 0 }
  0x12   :  { %27 = vsyncpa [#allocation16], 0 }
  0x13   :  { %29 = vsyncpa [#allocation16 + $0x1], 0 }
  0x14   :  { %30 = vsyncpa [#allocation19], 0 }
  0x15   :  { %32 = vsyncpa [#allocation19 + $0x1], 0 }
  0x16   :  { %33 = vsyncpa [#allocation22], 0 }
  0x17   :  { %35 = vsyncpa [#allocation22 + $0x1], 0 }
  0x18   :  { %36 = vsyncpa [#allocation5], 0  ;;  %s3709_s21 = smov 0   ;;  %s3711_s22 = smov 0  }
  0x19   :  { %s3713_s23 = smov 0   ;;  %s3715_s24 = smov 0  }
  0x1a   :  { %s3717_s25 = smov 0   ;;  %s3719_s26 = smov 0  }
  0x1b LB: > { %4650 = sst [smem:[#allocation32_spill]] %s3601_s23  ;;  %s51_s27 = sadd.s32 1, %s3609_s25  ;;  %s3613_s26 = sphi %s3719_s26, %s42_s26   ;;  %s3609_s25 = sphi %s3717_s25, %s4699_s25   ;;  %s3605_s24 = sphi %s3715_s24, %s4698_s24   ;;  %s3601_s23 = sphi %s3713_s23, %s4697_s23   ;;  %s3597_s22 = sphi %s3711_s22, %s4701_s22   ;;  %s3593_s21 = sphi %s3709_s21, %s4700_s21  }
  0x1c   : > { %4651 = sst [smem:[#allocation33_spill]] %s3605_s24  ;;  %s87_s28 = sadd.s32 1, %s3601_s23 }
  0x1d   : > { %4652 = sst [smem:[#allocation34_spill]] %s3609_s25  ;;  %p52_p0 = scmp.ge.s32.totalorder %s51_s27, 2 }
  0x1e   : > { %4653 = sst [smem:[#allocation35_spill]] %s3613_s26  ;;  %p94_p1 = scmp.ne.s32.totalorder %s3601_s23, %s3597_s22 }
  0x1f   : > { %p95_p2 = scmp.eq.s32.totalorder %s3613_s26, 0  ;;  %s4703_s27 = smov (%p52_p0, %s51_s27), 0 }
  0x20   : > { %4654 = sst [smem:[#allocation36_spill]] %s4703_s27  ;;  %p3023_p4 = scmp.lt.s32.totalorder %s3613_s26, 2 }
  0x21   : > { %p96_p3 = por %p95_p2, %p94_p1  ;;  %s84_s29 = ssub.s32 %s3609_s25, %s4703_s27 }
  0x22   : > { %s3750_s30 = sand.u32 1, %s3613_s26   ;;  %p85_p5 = scmp.eq.s32.totalorder %s84_s29, 0 }
  0x23   : > { %s3753_s13 = sand.u32 1, %s3601_s23   ;;  %s3756_s14 = sshll.u32 %s3609_s25, 4 }
  0x24   : > { %s3759_s15 = scalar_select %p85_p5, %s3601_s23, %s87_s28  }
  0x25   : > { %s4656_s1 = sld [smem:[#allocation39_spill]]  ;;  %s429_s19 = scalar_lea.vmem [#allocation6], %s3753_s13 }
  0x26   : > { %4655 = sst [smem:[#allocation37_spill]] %s3759_s15  ;;  %s436_s20 = sshll.u32 %s429_s19, 4  ;;  %s3772_s20 = int_to_ptr.vmem [resolvable:$true] %s436_s20 }
  0x27   : > { %p3768_p6 = pnand %p3023_p4, %p96_p3  ;;  %s3775_s28 = sshll.u32 %s3753_s13, 4 }
  0x29   : > { %s4657_s29 = scalar_select %p3768_p6, 1, 0 }
  0x2a   : > { %p3782_p8 = pneg %p3768_p6 }
  0x2b   : > { %s3765_s18 = scalar_lea.hbm %s4656_s1, %s3756_s14  ;;  %s3156_s23 = scalar_lea.hbm %s4656_s1, 32 }
  0x2c   : > { %s3151_s15 = scalar_lea.hbm %s3765_s18, 16  ;;  %p3157_p11 = scmp.lt.u32.totalorder %s3765_s18, %s4656_s1 }
  0x2d   : > { %p3152_p7 = scmp.ne.s32.totalorder %s3765_s18, %s3151_s15  ;;  %p3158_p12 = scmp.lt.u32.totalorder %s3156_s23, %s3151_s15 }
  0x2e   : > { %s4658_s16 = scalar_select %p3782_p8, 1, 0 }
  0x2f   : > { %p3154_p9 = pnand %p3782_p8, %p3152_p7  ;;  %p3159_p13 = por %p3158_p12, %p3157_p11 }
  0x30   : > { %p3160_p0 = scmp.lt.u32.totalorder %s3151_s15, %s3765_s18 }
  0x31   : > { %p3155_p10 = pneg %p3154_p9 }
  0x32   : > { %p3161_p1 = por %p3160_p0, %p3159_p13 }
  0x34   : > { %p3162_p2 = pnand %p3161_p1, %p3155_p10 }
  0x36   : > { %3165 = shalt.err (!%p3162_p2)
}
  0x37   : > { %s3166_s27 = scalar_lea.vmem %s3772_s20, 16  ;;  %s3615_s17 = smov [#allocation6]  }
  0x38   : > { %p3167_p3 = scmp.ne.s32.totalorder %s3772_s20, %s3166_s27  ;;  %s3171_s19 = sshll.u32 %s3615_s17, 4  ;;  %s3172_s19 = int_to_ptr.vmem [resolvable:$false] %s3171_s19 }
  0x39   : > { %s3173_s12 = scalar_lea.vmem %s3172_s19, 32  ;;  %p3174_p7 = scmp.lt.s32.totalorder %s3772_s20, %s3172_s19 }
  0x3a   : > { %p3169_p4 = pnand %p3167_p3, %p3782_p8  ;;  %p3175_p9 = scmp.lt.s32.totalorder %s3173_s12, %s3166_s27 }
  0x3c   : > { %p3170_p5 = pneg %p3169_p4  ;;  %p3176_p11 = por %p3175_p9, %p3174_p7 }
  0x3e   : > { %p3177_p12 = pnand %p3176_p11, %p3170_p5 }
  0x40   : > { %3180 = shalt.err (!%p3177_p12)
}
  0x41   : > { %s4659_s23 = scalar_lea.sflag [#allocation7], %s3750_s30  ;;  %s3808_s24 = sshll.u32 %s3609_s25, 8 }
  0x42   : > { %2991 = dma.hbm_to_vmem [thread:$0]  (!%p3768_p6), %s3765_s18, 16, %s3772_s20, %s4659_s23  }
  0x43   : > { %s4660_s3 = sld [smem:[#allocation41_spill]]  ;;  %s464_s19 = scalar_lea.vmem [#allocation9], %s3775_s28 }
  0x44   : > { %s471_s12 = sshll.u32 %s464_s19, 4  ;;  %s4622_s1 = scalar_lea.sflag [#allocation10], %s3750_s30  ;;  %s3817_s12 = int_to_ptr.vmem [resolvable:$true] %s471_s12 }
  0x49   : > { %s3814_s27 = scalar_lea.hbm %s4660_s3, %s3808_s24  ;;  %s3186_s23 = scalar_lea.hbm %s4660_s3, 512 }
  0x4a   : > { %s3181_s11 = scalar_lea.hbm %s3814_s27, 256  ;;  %p3187_p1 = scmp.lt.u32.totalorder %s3814_s27, %s4660_s3 }
  0x4b   : > { %p3182_p10 = scmp.ne.s32.totalorder %s3814_s27, %s3181_s11  ;;  %p3188_p2 = scmp.lt.u32.totalorder %s3186_s23, %s3181_s11 }
  0x4c   : > { %p3190_p4 = scmp.lt.u32.totalorder %s3181_s11, %s3814_s27 }
  0x4d   : > { %p3184_p13 = pnand %p3182_p10, %p3782_p8  ;;  %p3189_p3 = por %p3188_p2, %p3187_p1 }
  0x4f   : > { %p3185_p0 = pneg %p3184_p13  ;;  %p3191_p5 = por %p3190_p4, %p3189_p3 }
  0x51   : > { %p3192_p7 = pnand %p3191_p5, %p3185_p0 }
  0x53   : > { %3195 = shalt.err (!%p3192_p7)
}
  0x54   : > { %s3196_s19 = scalar_lea.vmem %s3817_s12, 256  ;;  %s3616_s18 = smov [#allocation9]  }
  0x55   : > { %p3197_p9 = scmp.ne.s32.totalorder %s3817_s12, %s3196_s19  ;;  %s3201_s20 = sshll.u32 %s3616_s18, 4  ;;  %s3202_s20 = int_to_ptr.vmem [resolvable:$false] %s3201_s20 }
  0x56   : > { %s3203_s15 = scalar_lea.vmem %s3202_s20, 512  ;;  %p3204_p10 = scmp.lt.s32.totalorder %s3817_s12, %s3202_s20 }
  0x57   : > { %p3199_p11 = pnand %p3197_p9, %p3782_p8  ;;  %p3205_p13 = scmp.lt.s32.totalorder %s3203_s15, %s3196_s19 }
  0x59   : > { %p3200_p12 = pneg %p3199_p11  ;;  %p3206_p1 = por %p3205_p13, %p3204_p10 }
  0x5b   : > { %p3207_p2 = pnand %p3206_p1, %p3200_p12 }
  0x5d   : > { %3210 = shalt.err (!%p3207_p2)
}
  0x5e   : > { %s4623_s11 = smov 64   ;;  %s4630_s23 = smov 4  }
  0x5f   : > { %2997 = dma.hbm_to_vmem [thread:$0]  (!%p3768_p6), %s3814_s27, 256, %s3817_s12, %s4622_s1, %s4623_s11, %s4623_s11, %s4630_s23  }
  0x60   : > { %s4661_s5 = sld [smem:[#allocation42_spill]]  ;;  %s505_s20 = scalar_lea.vmem [#allocation12], %s3753_s13 }
  0x61   : > { %s512_s15 = sshll.u32 %s505_s20, 4  ;;  %s4627_s3 = scalar_lea.sflag [#allocation13], %s3750_s30  ;;  %s513_s15 = int_to_ptr.vmem [resolvable:$true] %s512_s15 }
  0x66   : > { %s3850_s18 = scalar_lea.hbm %s4661_s5, %s3756_s14  ;;  %s3216_s12 = scalar_lea.hbm %s4661_s5, 32 }
  0x67   : > { %s3211_s10 = scalar_lea.hbm %s3850_s18, 16  ;;  %p3217_p5 = scmp.lt.u32.totalorder %s3850_s18, %s4661_s5 }
  0x68   : > { %p3212_p0 = scmp.ne.s32.totalorder %s3850_s18, %s3211_s10  ;;  %p3218_p7 = scmp.lt.u32.totalorder %s3216_s12, %s3211_s10 }
  0x69   : > { %p3220_p11 = scmp.lt.u32.totalorder %s3211_s10, %s3850_s18 }
  0x6a   : > { %p3214_p3 = pnand %p3212_p0, %p3782_p8  ;;  %p3219_p9 = por %p3218_p7, %p3217_p5 }
  0x6c   : > { %p3215_p4 = pneg %p3214_p3  ;;  %p3221_p12 = por %p3220_p11, %p3219_p9 }
  0x6e   : > { %p3222_p10 = pnand %p3221_p12, %p3215_p4 }
  0x70   : > { %3225 = shalt.err (!%p3222_p10)
}
  0x71   : > { %s3226_s20 = scalar_lea.vmem %s513_s15, 16  ;;  %s3619_s1 = smov [#allocation12]  }
  0x72   : > { %p3227_p13 = scmp.ne.s32.totalorder %s513_s15, %s3226_s20  ;;  %s3231_s11 = sshll.u32 %s3619_s1, 4  ;;  %s3232_s11 = int_to_ptr.vmem [resolvable:$false] %s3231_s11 }
  0x73   : > { %s3233_s25 = scalar_lea.vmem %s3232_s11, 32  ;;  %p3234_p0 = scmp.lt.s32.totalorder %s513_s15, %s3232_s11 }
  0x74   : > { %p3229_p1 = pnand %p3227_p13, %p3782_p8  ;;  %p3235_p3 = scmp.lt.s32.totalorder %s3233_s25, %s3226_s20 }
  0x76   : > { %p3230_p2 = pneg %p3229_p1  ;;  %p3236_p6 = por %p3235_p3, %p3234_p0 }
  0x78   : > { %p3237_p5 = pnand %p3236_p6, %p3230_p2 }
  0x7a   : > { %3240 = shalt.err (!%p3237_p5)
}
  0x7b   : > { %p4662_p7 = scmp.ne.s32.totalorder %s4657_s29, 0  ;;  %s4663_s7 = sld [smem:[#allocation43_spill]] }
  0x7c   : > { %s539_s11 = scalar_lea.vmem [#allocation15], %s3753_s13  ;;  %s4628_s17 = scalar_lea.sflag [#allocation16], %s3750_s30 }
  0x7d   : > { %3003 = dma.hbm_to_vmem [thread:$0]  (!%p4662_p7), %s3850_s18, 16, %s513_s15, %s4627_s3  }
  0x7e   : > { %s546_s12 = sshll.u32 %s539_s11, 4  ;;  %s547_s12 = int_to_ptr.vmem [resolvable:$true] %s546_s12 }
  0x81   : > { %s3877_s1 = scalar_lea.hbm %s4663_s7, %s3756_s14  ;;  %s3246_s15 = scalar_lea.hbm %s4663_s7, 32 }
  0x82   : > { %s3241_s19 = scalar_lea.hbm %s3877_s1, 16  ;;  %p3247_p11 = scmp.lt.u32.totalorder %s3877_s1, %s4663_s7 }
  0x83   : > { %p3242_p6 = scmp.ne.s32.totalorder %s3877_s1, %s3241_s19  ;;  %p3248_p12 = scmp.lt.u32.totalorder %s3246_s15, %s3241_s19 }
  0x84   : > { %p3250_p13 = scmp.lt.u32.totalorder %s3241_s19, %s3877_s1 }
  0x85   : > { %p3244_p4 = pnand %p3242_p6, %p3782_p8  ;;  %p3249_p10 = por %p3248_p12, %p3247_p11 }
  0x87   : > { %p3245_p9 = pneg %p3244_p4  ;;  %p3251_p1 = por %p3250_p13, %p3249_p10 }
  0x89   : > { %p3252_p2 = pnand %p3251_p1, %p3245_p9 }
  0x8b   : > { %3255 = shalt.err (!%p3252_p2)
}
  0x8c   : > { %s3256_s27 = scalar_lea.vmem %s547_s12, 16  ;;  %s3620_s11 = smov [#allocation15]  }
  0x8d   : > { %p3257_p0 = scmp.ne.s32.totalorder %s547_s12, %s3256_s27  ;;  %s3261_s3 = sshll.u32 %s3620_s11, 4  ;;  %s3262_s3 = int_to_ptr.vmem [resolvable:$false] %s3261_s3 }
  0x8e   : > { %s3263_s20 = scalar_lea.vmem %s3262_s3, 32  ;;  %p3264_p6 = scmp.lt.s32.totalorder %s547_s12, %s3262_s3 }
  0x8f   : > { %p3259_p3 = pnand %p3257_p0, %p3782_p8  ;;  %p3265_p4 = scmp.lt.s32.totalorder %s3263_s20, %s3256_s27 }
  0x91   : > { %p3260_p5 = pneg %p3259_p3  ;;  %p3266_p7 = por %p3265_p4, %p3264_p6 }
  0x93   : > { %p3267_p11 = pnand %p3266_p7, %p3260_p5 }
  0x95   : > { %3270 = shalt.err (!%p3267_p11)
}
  0x96   : > { %p4664_p12 = scmp.ne.s32.totalorder %s4657_s29, 0  ;;  %s4665_s9 = sld [smem:[#allocation44_spill]] }
  0x97   : > { %s577_s3 = scalar_lea.vmem [#allocation18], %s3753_s13  ;;  %s4629_s10 = scalar_lea.sflag [#allocation19], %s3750_s30 }
  0x98   : > { %3009 = dma.hbm_to_vmem [thread:$0]  (!%p4664_p12), %s3877_s1, 16, %s547_s12, %s4628_s17  }
  0x99   : > { %s584_s25 = sshll.u32 %s577_s3, 4  ;;  %s585_s25 = int_to_ptr.vmem [resolvable:$true] %s584_s25 }
  0x9c   : > { %s3904_s15 = scalar_lea.hbm %s4665_s9, %s3756_s14  ;;  %s3276_s12 = scalar_lea.hbm %s4665_s9, 32 }
  0x9d   : > { %s3271_s27 = scalar_lea.hbm %s3904_s15, 16  ;;  %p3277_p13 = scmp.lt.u32.totalorder %s3904_s15, %s4665_s9 }
  0x9e   : > { %p3272_p7 = scmp.ne.s32.totalorder %s3904_s15, %s3271_s27  ;;  %p3278_p1 = scmp.lt.u32.totalorder %s3276_s12, %s3271_s27 }
  0x9f   : > { %p3280_p0 = scmp.lt.u32.totalorder %s3271_s27, %s3904_s15 }
  0xa0   : > { %p3274_p9 = pnand %p3272_p7, %p3782_p8  ;;  %p3279_p2 = por %p3278_p1, %p3277_p13 }
  0xa2   : > { %p3275_p10 = pneg %p3274_p9  ;;  %p3281_p3 = por %p3280_p0, %p3279_p2 }
  0xa4   : > { %p3282_p5 = pnand %p3281_p3, %p3275_p10 }
  0xa6   : > { %3285 = shalt.err (!%p3282_p5)
}
  0xa7   : > { %s3286_s18 = scalar_lea.vmem %s585_s25, 16  ;;  %s3621_s3 = smov [#allocation18]  }
  0xa8   : > { %p3287_p6 = scmp.ne.s32.totalorder %s585_s25, %s3286_s18  ;;  %s3291_s17 = sshll.u32 %s3621_s3, 4  ;;  %s3292_s17 = int_to_ptr.vmem [resolvable:$false] %s3291_s17 }
  0xa9   : > { %s3293_s11 = scalar_lea.vmem %s3292_s17, 32  ;;  %p3294_p7 = scmp.lt.s32.totalorder %s585_s25, %s3292_s17 }
  0xaa   : > { %p3289_p4 = pnand %p3287_p6, %p3782_p8  ;;  %p3295_p9 = scmp.lt.s32.totalorder %s3293_s11, %s3286_s18 }
  0xac   : > { %p3290_p11 = pneg %p3289_p4  ;;  %p3296_p12 = por %p3295_p9, %p3294_p7 }
  0xae   : > { %p3297_p1 = pnand %p3296_p12, %p3290_p11 }
  0xb0   : > { %3300 = shalt.err (!%p3297_p1)
}
  0xb1   : > { %p4666_p13 = scmp.ne.s32.totalorder %s4657_s29, 0  ;;  %s3928_s27 = sadd.s32 4294967295, %s3613_s26  }
  0xb2   : > { %p100_p12 = scmp.ne.s32.totalorder %s3597_s22, %s3593_s21  ;;  %p4632_p10 = scmp.eq.s32.totalorder %s3928_s27, 0 }
  0xb3   : > { %3015 = dma.hbm_to_vmem [thread:$0]  (!%p4666_p13), %s3904_s15, 16, %s585_s25, %s4629_s10  }
  0xb4   : > { %p2646_p2 = scmp.ge.s32.totalorder %s3613_s26, 1  ;;  %p397_p0 = scmp.lt.s32.totalorder %s3613_s26, 3 }
  0xb5   : > { %p3937_p3 = por %p4632_p10, %p100_p12  ;;  %s3622_s15 = smov [#allocation3]  }
  0xb6   : > { %p3941_p5 = pnand %p2646_p2, %p397_p0  ;;  %s412_s25 = sshll.u32 %s3622_s15, 4  ;;  %s3945_s25 = int_to_ptr.vmem [resolvable:$true] %s412_s25 }
  0xb7   : > { %s4667_s17 = scalar_select %p3937_p3, 1, 0 }
  0xb8   : > { %s4668_s1 = scalar_select %p3941_p5, 1, 0 }
  0xb9   : > { %p2984_p6 = pneg %p3941_p5  ;;  %s4669_s2 = sld [smem:[#allocation40_spill]] }
  0xba   : > { %s446_s18 = scalar_lea.vmem [#allocation8], %s3753_s13  ;;  %s3968_s10 = scalar_lea.hbm %s4606_s4, %s3808_s24 }
  0xbb   : > { %p3957_p4 = pnand %p2984_p6, %p4632_p10  ;;  %s453_s3 = sshll.u32 %s446_s18, 4  ;;  %s3962_s3 = int_to_ptr.vmem [resolvable:$true] %s453_s3 }
  0xbc   : > { %s4671_s0 = sld [smem:[#allocation38_spill]] }
  0xbd   : > { %p3303_p7 = pneg %p3957_p4 }
  0xbf   : > { %s3953_s20 = scalar_lea.hbm %s4669_s2, %s3756_s14 }
  0xc2   : > { %s3301_s21 = scalar_lea.hbm %s4671_s0, 256 }
  0xc3   : > { %p3302_p11 = scmp.ne.s32.totalorder %s4671_s0, %s3301_s21  ;;  %p3308_p12 = scmp.lt.u32.totalorder %s3301_s21, %s4671_s0 }
  0xc5   : > { %p3304_p9 = pnand %p3303_p7, %p3302_p11 }
  0xc7   : > { %p3305_p1 = pneg %p3304_p9 }
  0xc9   : > { %p3310_p2 = pnand %p3308_p12, %p3305_p1 }
  0xcb   : > { %3313 = shalt.err (!%p3310_p2)
}
  0xcc   : > { %s3314_s11 = scalar_lea.vmem %s3945_s25, 256  ;;  %p3322_p3 = scmp.lt.s32.totalorder %s3945_s25, %s3945_s25 }
  0xcd   : > { %p3315_p0 = scmp.ne.s32.totalorder %s3945_s25, %s3314_s11  ;;  %p3323_p5 = scmp.lt.s32.totalorder %s3314_s11, %s3314_s11 }
  0xcf   : > { %p3317_p6 = pnand %p3315_p0, %p3303_p7  ;;  %p3324_p13 = por %p3323_p5, %p3322_p3 }
  0xd1   : > { %p3318_p10 = pneg %p3317_p6 }
  0xd3   : > { %p3325_p8 = pnand %p3324_p13, %p3318_p10 }
  0xd5   : > { %3328 = shalt.err (!%p3325_p8)
}
  0xd6   : > { %s3623_s5 = smov 128   ;;  %s3624_s7 = smov 8  }
  0xd7   : > { %2987 = dma.hbm_to_vmem [thread:$0]  (!%p3957_p4), %s4671_s0, 256, %s3945_s25, [#allocation4], %s3623_s5, %s3623_s5, %s3624_s7  }
  0xd8   : > { %s3329_s15 = scalar_lea.hbm %s3953_s20, 16  ;;  %p4672_p7 = scmp.ne.s32.totalorder %s4658_s16, 0 }
  0xd9   : > { %p3330_p11 = scmp.ne.s32.totalorder %s3953_s20, %s3329_s15  ;;  %s3334_s18 = scalar_lea.hbm %s4669_s2, 32 }
  0xda   : > { %p3335_p8 = scmp.lt.u32.totalorder %s3953_s20, %s4669_s2  ;;  %p3336_p10 = scmp.lt.u32.totalorder %s3334_s18, %s3329_s15 }
  0xdb   : > { %p3332_p3 = pnand %p3330_p11, %p4672_p7  ;;  %p3338_p9 = scmp.lt.u32.totalorder %s3329_s15, %s3953_s20 }
  0xdc   : > { %p3337_p5 = por %p3336_p10, %p3335_p8 }
  0xdd   : > { %p3333_p13 = pneg %p3332_p3 }
  0xde   : > { %p3339_p1 = por %p3338_p9, %p3337_p5 }
  0xe0   : > { %p3340_p12 = pnand %p3339_p1, %p3333_p13 }
  0xe2   : > { %3343 = shalt.err (!%p3340_p12)
}
  0xe3   : > { %s3344_s25 = scalar_lea.vmem %s3962_s3, 16  ;;  %s3625_s19 = smov [#allocation8]  }
  0xe4   : > { %p3345_p4 = scmp.ne.s32.totalorder %s3962_s3, %s3344_s25  ;;  %s3349_s5 = sshll.u32 %s3625_s19, 4  ;;  %s3350_s5 = int_to_ptr.vmem [resolvable:$false] %s3349_s5 }
  0xe5   : > { %s3351_s26 = scalar_lea.vmem %s3350_s5, 32  ;;  %p3352_p6 = scmp.lt.s32.totalorder %s3962_s3, %s3350_s5 }
  0xe6   : > { %p3347_p2 = pnand %p3345_p4, %p4672_p7  ;;  %p3353_p11 = scmp.lt.s32.totalorder %s3351_s26, %s3344_s25 }
  0xe8   : > { %p3348_p0 = pneg %p3347_p2  ;;  %p3354_p3 = por %p3353_p11, %p3352_p6 }
  0xea   : > { %p3355_p8 = pnand %p3354_p3, %p3348_p0 }
  0xec   : > { %3358 = shalt.err (!%p3355_p8)
}
  0xed   : > { %p4673_p13 = scmp.ne.s32.totalorder %s4657_s29, 0  ;;  %s4674_s7 = scalar_lea.sflag [#allocation7], %s3750_s30 }
  0xee   : > { %s485_s9 = scalar_lea.vmem [#allocation11], %s3775_s28  ;;  %s4021_s12 = scalar_lea.hbm %s4608_s6, %s3756_s14 }
  0xef   : > { %2994 = dma.hbm_to_vmem [thread:$0]  (!%p4673_p13), %s3953_s20, 16, %s3962_s3, %s4674_s7  }
  0xf0   : > { %s492_s23 = sshll.u32 %s485_s9, 4  ;;  %s3359_s18 = scalar_lea.hbm %s3968_s10, 256  ;;  %s4015_s23 = int_to_ptr.vmem [resolvable:$true] %s492_s23 }
  0xf1   : > { %p3360_p10 = scmp.ne.s32.totalorder %s3968_s10, %s3359_s18  ;;  %s3364_s19 = scalar_lea.hbm %s4606_s4, 512 }
  0xf2   : > { %p3365_p1 = scmp.lt.u32.totalorder %s3968_s10, %s4606_s4  ;;  %p3366_p12 = scmp.lt.u32.totalorder %s3364_s19, %s3359_s18 }
  0xf3   : > { %p3362_p5 = pnand %p3360_p10, %p4672_p7  ;;  %p3368_p2 = scmp.lt.u32.totalorder %s3359_s18, %s3968_s10 }
  0xf4   : > { %p3367_p4 = por %p3366_p12, %p3365_p1 }
  0xf5   : > { %p3363_p9 = pneg %p3362_p5 }
  0xf6   : > { %p3369_p0 = por %p3368_p2, %p3367_p4 }
  0xf8   : > { %p3370_p6 = pnand %p3369_p0, %p3363_p9 }
  0xfa   : > { %3373 = shalt.err (!%p3370_p6)
}
  0xfb   : > { %s3374_s3 = scalar_lea.vmem %s4015_s23, 256  ;;  %s3626_s26 = smov [#allocation11]  }
  0xfc   : > { %p3375_p11 = scmp.ne.s32.totalorder %s4015_s23, %s3374_s3  ;;  %s3379_s7 = sshll.u32 %s3626_s26, 4  ;;  %s3380_s7 = int_to_ptr.vmem [resolvable:$false] %s3379_s7 }
  0xfd   : > { %s3381_s9 = scalar_lea.vmem %s3380_s7, 512  ;;  %p3382_p10 = scmp.lt.s32.totalorder %s4015_s23, %s3380_s7 }
  0xfe   : > { %p3377_p3 = pnand %p3375_p11, %p4672_p7  ;;  %p3383_p5 = scmp.lt.s32.totalorder %s3381_s9, %s3374_s3 }
 0x100   : > { %p3378_p8 = pneg %p3377_p3  ;;  %p3384_p1 = por %p3383_p5, %p3382_p10 }
 0x102   : > { %p3385_p12 = pnand %p3384_p1, %p3378_p8 }
 0x104   : > { %3388 = shalt.err (!%p3385_p12)
}
 0x105   : > { %s4675_s15 = smov 4   ;;  %s4676_s21 = smov 64  }
 0x106   : > { %s4677_s18 = scalar_lea.sflag [#allocation10], %s3750_s30  ;;  %s522_s11 = scalar_lea.vmem [#allocation14], %s3753_s13 }
 0x107   : > { %3000 = dma.hbm_to_vmem [thread:$0]  (!%p4673_p13), %s3968_s10, 256, %s4015_s23, %s4677_s18, %s4676_s21, %s4676_s21, %s4675_s15  }
 0x108   : > { %s529_s25 = sshll.u32 %s522_s11, 4  ;;  %s4054_s20 = scalar_lea.hbm %s4610_s8, %s3808_s24  ;;  %s530_s25 = int_to_ptr.vmem [resolvable:$true] %s529_s25 }
 0x109   : > { %s3389_s3 = scalar_lea.hbm %s4021_s12, 16  ;;  %s3394_s9 = scalar_lea.hbm %s4608_s6, 32 }
 0x10a   : > { %p3390_p9 = scmp.ne.s32.totalorder %s4021_s12, %s3389_s3  ;;  %p3395_p0 = scmp.lt.u32.totalorder %s4021_s12, %s4608_s6 }
 0x10b   : > { %p3396_p6 = scmp.lt.u32.totalorder %s3394_s9, %s3389_s3  ;;  %p3398_p3 = scmp.lt.u32.totalorder %s3389_s3, %s4021_s12 }
 0x10c   : > { %p3392_p4 = pnand %p3390_p9, %p4672_p7 }
 0x10d   : > { %p3397_p11 = por %p3396_p6, %p3395_p0 }
 0x10e   : > { %p3393_p2 = pneg %p3392_p4 }
 0x10f   : > { %p3399_p8 = por %p3398_p3, %p3397_p11 }
 0x111   : > { %p3400_p10 = pnand %p3399_p8, %p3393_p2 }
 0x113   : > { %3403 = shalt.err (!%p3400_p10)
}
 0x114   : > { %s3404_s24 = scalar_lea.vmem %s530_s25, 16  ;;  %s3627_s10 = smov [#allocation14]  }
 0x115   : > { %p3405_p5 = scmp.ne.s32.totalorder %s530_s25, %s3404_s24  ;;  %s3409_s23 = sshll.u32 %s3627_s10, 4  ;;  %s3410_s23 = int_to_ptr.vmem [resolvable:$false] %s3409_s23 }
 0x116   : > { %s3411_s18 = scalar_lea.vmem %s3410_s23, 32  ;;  %p3412_p9 = scmp.lt.s32.totalorder %s530_s25, %s3410_s23 }
 0x117   : > { %p3407_p1 = pnand %p3405_p5, %p4672_p7  ;;  %p3413_p4 = scmp.lt.s32.totalorder %s3411_s18, %s3404_s24 }
 0x119   : > { %p3408_p12 = pneg %p3407_p1  ;;  %p3414_p13 = por %p3413_p4, %p3412_p9 }
 0x11b   : > { %p3415_p0 = pnand %p3414_p13, %p3408_p12 }
 0x11d   : > { %3418 = shalt.err (!%p3415_p0)
}
 0x11e   : > { %p4678_p6 = scmp.ne.s32.totalorder %s4657_s29, 0  ;;  %s4679_s0 = scalar_lea.sflag [#allocation13], %s3750_s30 }
 0x11f   : > { %s557_s2 = scalar_lea.vmem [#allocation17], %s3775_s28  ;;  %s2664_s19 = sshll.u32 %s3753_s13, 5 }
 0x120   : > { %3006 = dma.hbm_to_vmem [thread:$0]  (!%p4678_p6), %s4021_s12, 16, %s530_s25, %s4679_s0  }
 0x121   : > { %s564_s11 = sshll.u32 %s557_s2, 4  ;;  %s3419_s5 = scalar_lea.hbm %s4054_s20, 256  ;;  %s4077_s11 = int_to_ptr.vmem [resolvable:$true] %s564_s11 }
 0x122   : > { %p3420_p13 = scmp.ne.s32.totalorder %s4054_s20, %s3419_s5  ;;  %s3424_s7 = scalar_lea.hbm %s4610_s8, 512 }
 0x123   : > { %p3425_p3 = scmp.lt.u32.totalorder %s4054_s20, %s4610_s8  ;;  %p3426_p8 = scmp.lt.u32.totalorder %s3424_s7, %s3419_s5 }
 0x124   : > { %p3422_p2 = pnand %p3420_p13, %p4672_p7  ;;  %p3428_p5 = scmp.lt.u32.totalorder %s3419_s5, %s4054_s20 }
 0x125   : > { %p3427_p10 = por %p3426_p8, %p3425_p3 }
 0x126   : > { %p3423_p11 = pneg %p3422_p2 }
 0x127   : > { %p3429_p1 = por %p3428_p5, %p3427_p10 }
 0x129   : > { %p3430_p12 = pnand %p3429_p1, %p3423_p11 }
 0x12b   : > { %3433 = shalt.err (!%p3430_p12)
}
 0x12c   : > { %s3434_s28 = scalar_lea.vmem %s4077_s11, 256  ;;  %s3628_s12 = smov [#allocation17]  }
 0x12d   : > { %p3435_p9 = scmp.ne.s32.totalorder %s4077_s11, %s3434_s28  ;;  %s3439_s25 = sshll.u32 %s3628_s12, 4  ;;  %s3440_s25 = int_to_ptr.vmem [resolvable:$false] %s3439_s25 }
 0x12e   : > { %s3441_s10 = scalar_lea.vmem %s3440_s25, 512  ;;  %p3442_p13 = scmp.lt.s32.totalorder %s4077_s11, %s3440_s25 }
 0x12f   : > { %p3437_p4 = pnand %p3435_p9, %p4672_p7  ;;  %p3443_p2 = scmp.lt.s32.totalorder %s3441_s10, %s3434_s28 }
 0x131   : > { %p3438_p0 = pneg %p3437_p4  ;;  %p3444_p3 = por %p3443_p2, %p3442_p13 }
 0x133   : > { %p3445_p8 = pnand %p3444_p3, %p3438_p0 }
 0x135   : > { %3448 = shalt.err (!%p3445_p8)
}
 0x136   : > { %s4680_s23 = scalar_lea.sflag [#allocation16], %s3750_s30  ;;  %s4681_s18 = sld [smem:[#allocation34_spill]] }
 0x137   : > { %3012 = dma.hbm_to_vmem [thread:$0]  (!%p4678_p6), %s4054_s20, 256, %s4077_s11, %s4680_s23, %s4676_s21, %s4676_s21, %s4675_s15  }
 0x138   : > { %s595_s2 = scalar_lea.vmem [#allocation20], %s2664_s19  ;;  %s4682_s7 = sld [smem:[#allocation45_spill]] }
 0x139   : > { %s602_s5 = sshll.u32 %s595_s2, 4  ;;  %s4113_s5 = int_to_ptr.vmem [resolvable:$true] %s602_s5 }
 0x13c   : > { %s2725_s0 = sshll.u32 %s4681_s18, 9 }
 0x13e   : > { %s4111_s9 = scalar_lea.hbm %s4682_s7, %s2725_s0  ;;  %s3454_s19 = scalar_lea.hbm %s4682_s7, 1024 }
 0x13f   : > { %s3449_s24 = scalar_lea.hbm %s4111_s9, 512  ;;  %p3455_p1 = scmp.lt.u32.totalorder %s4111_s9, %s4682_s7 }
 0x140   : > { %p3450_p11 = scmp.ne.s32.totalorder %s4111_s9, %s3449_s24  ;;  %p3456_p12 = scmp.lt.u32.totalorder %s3454_s19, %s3449_s24 }
 0x141   : > { %p3458_p4 = scmp.lt.u32.totalorder %s3449_s24, %s4111_s9 }
 0x142   : > { %p3452_p10 = pnand %p3450_p11, %p4672_p7  ;;  %p3457_p9 = por %p3456_p12, %p3455_p1 }
 0x144   : > { %p3453_p5 = pneg %p3452_p10  ;;  %p3459_p0 = por %p3458_p4, %p3457_p9 }
 0x146   : > { %p3460_p13 = pnand %p3459_p0, %p3453_p5 }
 0x148   : > { %3463 = shalt.err (!%p3460_p13)
}
 0x149   : > { %s3464_s25 = scalar_lea.vmem %s4113_s5, 512  ;;  %s3629_s10 = smov [#allocation20]  }
 0x14a   : > { %p3465_p2 = scmp.ne.s32.totalorder %s4113_s5, %s3464_s25  ;;  %s3469_s23 = sshll.u32 %s3629_s10, 4  ;;  %s3470_s23 = int_to_ptr.vmem [resolvable:$false] %s3469_s23 }
 0x14b   : > { %s3471_s18 = scalar_lea.vmem %s3470_s23, 1024  ;;  %p3472_p11 = scmp.lt.s32.totalorder %s4113_s5, %s3470_s23 }
 0x14c   : > { %p3467_p3 = pnand %p3465_p2, %p4672_p7  ;;  %p3473_p10 = scmp.lt.s32.totalorder %s3471_s18, %s3464_s25 }
 0x14e   : > { %p3468_p8 = pneg %p3467_p3  ;;  %p3474_p1 = por %p3473_p10, %p3472_p11 }
 0x150   : > { %p3475_p12 = pnand %p3474_p1, %p3468_p8 }
 0x152   : > { %3478 = shalt.err (!%p3475_p12)
}
 0x153   : > { %s4683_s0 = scalar_lea.sflag [#allocation19], %s3750_s30  ;;  %s4684_s26 = sld [smem:[#allocation46_spill]] }
 0x154   : > { %3018 = dma.hbm_to_vmem [thread:$0]  (!%p4678_p6), %s4111_s9, 512, %s4113_s5, %s4683_s0, %s4676_s21, %s4676_s21, %s4675_s15  }
 0x155   : > { %s615_s11 = scalar_lea.vmem [#allocation21], %s3753_s13  ;;  %s613_s30 = scalar_lea.sflag [#allocation22], %s3753_s13 }
 0x156   : > { %s622_s19 = sshll.u32 %s615_s11, 4  ;;  %s623_s19 = int_to_ptr.vmem [resolvable:$true] %s622_s19 }
 0x159   : > { %s4685_s20 = smov %s4684_s26  ;;  %s4145_s24 = scalar_lea.hbm %s4684_s26, %s3756_s14 }
 0x15a   : > { %s3479_s28 = scalar_lea.hbm %s4145_s24, 16  ;;  %s3484_s21 = scalar_lea.hbm %s4685_s20, 32 }
 0x15b   : > { %p3480_p5 = scmp.ne.s32.totalorder %s4145_s24, %s3479_s28  ;;  %p3485_p0 = scmp.lt.u32.totalorder %s4145_s24, %s4685_s20 }
 0x15c   : > { %p3486_p13 = scmp.lt.u32.totalorder %s3484_s21, %s3479_s28  ;;  %p3488_p3 = scmp.lt.u32.totalorder %s3479_s28, %s4145_s24 }
 0x15d   : > { %p3482_p9 = pnand %p3480_p5, %p4672_p7 }
 0x15e   : > { %p3487_p2 = por %p3486_p13, %p3485_p0 }
 0x15f   : > { %p3483_p4 = pneg %p3482_p9 }
 0x160   : > { %p3489_p8 = por %p3488_p3, %p3487_p2 }
 0x162   : > { %p3490_p11 = pnand %p3489_p8, %p3483_p4 }
 0x164   : > { %3493 = shalt.err (!%p3490_p11)
}
 0x165   : > { %s3494_s13 = scalar_lea.vmem %s623_s19, 16  ;;  %s3630_s9 = smov [#allocation21]  }
 0x166   : > { %p3495_p10 = scmp.ne.s32.totalorder %s623_s19, %s3494_s13  ;;  %s3499_s25 = sshll.u32 %s3630_s9, 4  ;;  %s3500_s25 = int_to_ptr.vmem [resolvable:$false] %s3499_s25 }
 0x167   : > { %s3501_s10 = scalar_lea.vmem %s3500_s25, 32  ;;  %p3502_p5 = scmp.lt.s32.totalorder %s623_s19, %s3500_s25 }
 0x168   : > { %p3497_p1 = pnand %p3495_p10, %p4672_p7  ;;  %p3503_p9 = scmp.lt.s32.totalorder %s3501_s10, %s3494_s13 }
 0x16a   : > { %p3498_p12 = pneg %p3497_p1  ;;  %p3504_p6 = por %p3503_p9, %p3502_p5 }
 0x16c   : > { %p3505_p0 = pnand %p3504_p6, %p3498_p12 }
 0x16e   : > { %3508 = shalt.err (!%p3505_p0)
}
 0x16f   : > { %p4686_p13 = scmp.ne.s32.totalorder %s4657_s29, 0  ;;  %p4687_p4 = scmp.ne.s32.totalorder %s4668_s1, 0 }
 0x170   : > { %p4688_p2 = scmp.eq.s32.totalorder (!%p4687_p4), %s3928_s27, 0 }
 0x171   : > { %3021 = dma.hbm_to_vmem [thread:$0]  (!%p4686_p13), %s4145_s24, 16, %s623_s19, %s613_s30  }
 0x172   : > { %631 = sbr.rel (%p4687_p4) target bundleno = 5735 (0x1667), region = 68 }
 0x179   : > { %3560 = dma.done.wait (%p4688_p2), [#allocation4], 256   ;;  %p4689_p7 = pmov %p4688_p2 }
 0x17a   : > { %s637_s16 = sand.u32 1, %s3928_s27   ;;  %s4174_s23 = sand.u32 1, %s3597_s22  }
 0x17b   : > { %3562 = vsyncadd (%p4689_p7), [#allocation4], 4294967040  ;;  %s638_s18 = scalar_lea.sflag [#allocation7], %s637_s16  ;;  %s640_s29 = scalar_lea.vmem [#allocation6], %s4174_s23 }
 0x17c   : > { %p4690_p6 = scmp.ne.s32.totalorder %s4667_s17, 0 }
 0x17e   : > { %3564 = dma.done.wait (%p4690_p6), %s638_s18, 32  }
 0x17f   : > { %3566 = vsyncadd (%p4690_p6), %s638_s18, 4294967264  ;;  %s4182_s1 = sshll.u32 %s4174_s23, 4  ;;  %s648_s0 = scalar_lea.vmem [#allocation8], %s4174_s23 }
 0x180   : > { %s654_s2 = scalar_lea.sflag [#allocation10], %s637_s16  ;;  %s657_s3 = scalar_lea.vmem [#allocation9], %s4182_s1 }
 0x181   : > { %3568 = dma.done.wait (%p4690_p6), %s654_s2, 512  }
 0x182   : > { %3570 = vsyncadd (%p4690_p6), %s654_s2, 4294966784  ;;  %s666_s26 = scalar_lea.vmem [#allocation11], %s4182_s1  ;;  %s672_s24 = scalar_lea.sflag [#allocation13], %s637_s16 }
 0x183   : > { %s674_s11 = scalar_lea.vmem [#allocation12], %s4174_s23 }
 0x184   : > { %3572 = dma.done.wait (%p4690_p6), %s672_s24, 32  }
 0x185   : > { %3574 = vsyncadd (%p4690_p6), %s672_s24, 4294967264  ;;  %s682_s19 = scalar_lea.vmem [#allocation14], %s4174_s23  ;;  %s688_s30 = scalar_lea.sflag [#allocation16], %s637_s16 }
 0x186   : > { %s690_s28 = scalar_lea.vmem [#allocation15], %s4174_s23 }
 0x187   : > { %3576 = dma.done.wait (%p4690_p6), %s688_s30, 272  }
 0x188   : > { %3578 = vsyncadd (%p4690_p6), %s688_s30, 4294967024  ;;  %s699_s12 = scalar_lea.vmem [#allocation17], %s4182_s1  ;;  %s705_s15 = scalar_lea.sflag [#allocation19], %s637_s16 }
 0x189   : > { %s707_s21 = scalar_lea.vmem [#allocation18], %s4174_s23 }
 0x18a   : > { %3580 = dma.done.wait (%p4690_p6), %s705_s15, 528  }
 0x18b   : > { %3582 = vsyncadd (%p4690_p6), %s705_s15, 4294966768  ;;  %s2673_s5 = sshll.u32 %s4174_s23, 5  ;;  %s722_s13 = scalar_lea.sflag [#allocation22], %s4174_s23 }
 0x18c   : > { %s4209_s14 = scalar_lea.vmem [#allocation20], %s2673_s5  ;;  %s724_s9 = scalar_lea.vmem [#allocation21], %s4174_s23 }
 0x18d   : > { %3584 = dma.done.wait (%p4690_p6), %s722_s13, 16  }
 0x18e   : > { %3586 = vsyncadd (%p4690_p6), %s722_s13, 4294967280  ;;  %s4691_s25 = sld [smem:[#allocation33_spill]] }
 0x194   : > { %p2674_p3 = scmp.ne.s32.totalorder %s4691_s25, 0 }
 0x195   : > { %v810_v0 = vld [vmem:[#allocation3] sm:$0xff] (!%p2674_p3)  ;;  %vm812_vm0 = vcmask (!%p2674_p3), 261120   ;;  %v811_v1 = vld [vmem:[#allocation3 + $0x8] sm:$0xff] (!%p2674_p3) }
 0x196   : > { %809 = sbr.rel (%p2674_p3) target bundleno = 413 (0x19d), region = 120  ;;  %813 = vst.msk [vmem:[#allocation2] sm:$0xff] (!%p2674_p3), %vm812_vm0, %v810_v0  ;;  %814 = vst.msk [vmem:[#allocation2 + $0x8] sm:$0xff] (!%p2674_p3), %vm812_vm0, %v811_v1 }
 0x19d PF: > { %v4218_v2 = vld [vmem:[#allocation2] sm:$0xff]  ;;  %vm843_vm1 = vcmask 261120   ;;  %v3631_v10 = vmov 0.0   ;;  %vm3632_vm2 = vmmov 0   ;;  %s3633_s17 = smov 104   ;;  %s3634_s10 = smov 120  }
 0x19e   : > { %v844_v3 = vsel %vm843_vm1, %v4218_v2, 0.0  ;;  %v4226_v9 = vld [vmem:[%s657_s3] sm:$0xff]   ;;  %2786 = vmatprep.subr.bf16.mxu1 %v3631_v10  ;;  %2790 = vmatprep.mubr.msk.bf16.mxu1 %vm3632_vm2, %v3631_v10  ;;  %v4234_v11 = vld [vmem:[%s657_s3 + $0x8] sm:$0xff]   ;;  %s3635_s16 = smov 112   ;;  %s3636_s18 = smov 96   ;;  %vm947_vm3 = vcmask 64512  }
 0x19f   : > { %845 = vadd.xlane.f32.xlu0 %v844_v3  ;;  %2787 = vmatpush3.bf16.msra.mxu1 %v4226_v9  ;;  %v4244_v16 = vld [vmem:[%s640_s29] ss:$0 sm:$0xff]  ;;  %s3637_s29 = smov 64   ;;  %vm1191_vm4 = vcmask 1043456   ;;  %s3639_s2 = smov 16   ;;  %vm1392_vm5 = vcmask 130048  }
 0x1a0   : > { %2800 = vmatprep.subr.bf16.mxu0 %v3631_v10  ;;  %2788 = vmatprep.subr.bf16.mxu1 %v3631_v10  ;;  %v4248_v18 = vld [vmem:[%s648_s0] ss:$0 sm:$0xff]  ;;  %s3638_s0 = smov 8   ;;  %s3640_s3 = smov 24   ;;  %vm1394_vm6 = vcmask 195584   ;;  %vm1606_vm8 = vcmask 523264  }
 0x1a1   : > { %2802 = vmatprep.mubr.msk.bf16.mxu0 %vm3632_vm2, %v3631_v10  ;;  %s4692_s1 = sld [smem:[#allocation33_spill]] }
 0x1a3   : > { %2789 = vmatpush3.bf16.msra.mxu1 %v4234_v11 }
 0x1a4   : > { %2794 = vmatprep.subr.bf16.mxu1 %v3631_v10 }
 0x1a7   : > { %p2704_p8 = scmp.ne.s32.totalorder %s4692_s1, 1 }
 0x22c   : > { %v846_v4 = vpop.xlane.xlu0 %845 }
 0x22d   : > { %v848_v5 = vmul.f32 0.03125, %v846_v4 }
 0x22f   : > { %v849_v6 = vsub.f32 %v4218_v2, %v848_v5 }
 0x231   : > { %v850_v7 = vmul.f32 %v849_v6, %v849_v6 }
 0x233   : > { %v851_v8 = vsel %vm843_vm1, %v850_v7, 0.0 }
 0x234   : > { %852 = vadd.xlane.f32.xlu0 %v851_v8 }
 0x2c1   : > { %v853_v12 = vpop.xlane.xlu0 %852 }
 0x2c2   : > { %v854_v13 = vmul.f32 0.03125, %v853_v12 }
 0x2c4   : > { %v855_v14 = vadd.f32 1e-05, %v854_v13 }
 0x2c6   : > { %3103 = vrsqrt.f32 %v855_v14 }
 0x2d0   : > { %v3104_v15 = vpop.eup %3103 }
 0x2d1   : > { %v857_v17 = vmul.f32 %v3104_v15, %v849_v6 }
 0x2d3   : > { %v864_v19 = vmul.f32 %v4244_v16, %v857_v17 }
 0x2d5   : > { %v871_v20 = vadd.f32 %v4248_v18, %v864_v19 }
 0x2d7   : > { %v872_v21 = vpack.c.bf16 %v871_v20, %v871_v20 }
 0x2d9   : > { %2791 = vmatmul.mubr.msk.bf16.vlgmr.msra.gmra.mrb[0].mxu1 %vm843_vm1, %v872_v21 }
 0x2da   : > { %2796 = vmatprep.mubr.msk.bf16.mxu1 %vm3632_vm2, %v3631_v10 }
 0x3ac   : > { %v922_v22 = vpop.f32.mrb[0].mxu1 }
 0x3ad   : > { %v928_v23 = vmul.f32 0.35355338, %v922_v22  ;;  %v4255_v24 = vpack.c.bf16 %v922_v22, %v922_v22  ;;  %v2792_v25 = vpop.f32.mrb[1].mxu1 }
 0x3ae   : > { %v925_v26 = vpop.f32.mrb[2].mxu1 }
 0x3af   : > { %943 = vrot.lane.b32.xlu0 %v4255_v24, %s3633_s17  ;;  %939 = vrot.lane.b32.xlu1 %v4255_v24, %s3634_s10  ;;  %v2793_v27 = vpop.f32.mrb[3].mxu1  ;;  %v929_v28 = vpack.c.bf16 %v928_v23, %v928_v23 }
 0x3b3   : > { %941 = vrot.lane.b32.xlu1 %v4255_v24, %s3635_s16  ;;  %936 = vrot.lane.b32.xlu0 %v929_v28, %s3633_s17 }
 0x3b7   : > { %945 = vrot.lane.b32.xlu1 %v4255_v24, %s3636_s18 }
 0x3bb   : > { %932 = vrot.lane.b32.xlu1 %v929_v28, %s3634_s10 }
 0x421   : > { %v940_v29 = vpop.permute.xlu1 %939  ;;  %v4272_v31 = vpop.permute.xlu0 %943 }
 0x422   : > { %994 = vrot.lane.b32.xlu1 %v940_v29, %s3636_s18 }
 0x425   : > { %v4268_v30 = vpop.permute.xlu1 %941  ;;  %v937_v42 = vpop.permute.xlu0 %936 }
 0x426   : > { %1042 = vrot.lane.b32.xlu1 %v4268_v30, %s3636_s18 }
 0x429   : > { %v946_v32 = vpop.permute.xlu1 %945 }
 0x42a   : > { %v952_v33 = vsel %vm947_vm3, %v946_v32, 0  ;;  %1090 = vrot.lane.b32.xlu1 %v4272_v31, %s3636_s18 }
 0x42b   : > { %2795 = vmatpush3.bf16.xpose.msra.mxu1 %v952_v33 }
 0x42c   : > { %2806 = vmatprep.subr.bf16.mxu1 %v3631_v10 }
 0x42d   : > { %v933_v34 = vpop.permute.xlu1 %932 }
 0x42e   : > { %934 = vrot.lane.b32.xlu1 %v929_v28, %s3635_s16 }
 0x432   : > { %2797 = vmatmul.mubr.msk.bf16.vlgmr.msra.gmra.mrb[4].mxu1 %vm947_vm3, %v929_v28 }
 0x433   : > { %2808 = vmatprep.mubr.msk.bf16.mxu1 %vm3632_vm2, %v3631_v10 }
 0x494   : > { %v995_v35 = vpop.permute.xlu1 %994 }
 0x495   : > { %v1000_v36 = vsel %vm947_vm3, %v995_v35, 0 }
 0x496   : > { %2801 = vmatpush3.bf16.xpose.msra.mxu0 %v1000_v36 }
 0x497   : > { %2812 = vmatprep.subr.bf16.mxu0 %v3631_v10 }
 0x498   : > { %v1043_v37 = vpop.permute.xlu1 %1042 }
 0x499   : > { %v1048_v38 = vsel %vm947_vm3, %v1043_v37, 0 }
 0x49a   : > { %2807 = vmatpush3.bf16.xpose.msra.mxu1 %v1048_v38 }
 0x49b   : > { %2818 = vmatprep.subr.bf16.mxu1 %v3631_v10 }
 0x49c   : > { %v1091_v39 = vpop.permute.xlu1 %1090 }
 0x49d   : > { %v1096_v40 = vsel %vm947_vm3, %v1091_v39, 0  ;;  %2803 = vmatmul.mubr.msk.bf16.vlgmr.msra.gmra.mrb[0].mxu0 %vm947_vm3, %v933_v34 }
 0x49e   : > { %2813 = vmatpush3.bf16.xpose.msra.mxu0 %v1096_v40  ;;  %2814 = vmatprep.mubr.msk.bf16.mxu0 %vm3632_vm2, %v3631_v10 }
 0x49f   : > { %2824 = vmatprep.subr.bf16.mxu0 %v3631_v10 }
 0x4a0   : > { %v935_v41 = vpop.permute.xlu1 %934 }
 0x4a1   : > { %2809 = vmatmul.mubr.msk.bf16.vlgmr.msra.gmra.mrb[8].mxu1 %vm947_vm3, %v935_v41 }
 0x4a2   : > { %2820 = vmatprep.mubr.msk.bf16.mxu1 %vm3632_vm2, %v3631_v10 }
 0x4a5   : > { %2815 = vmatmul.mubr.msk.bf16.vlgmr.msra.gmra.mrb[4].mxu0 %vm947_vm3, %v937_v42 }
 0x4a6   : > { %2826 = vmatprep.mubr.msk.bf16.mxu0 %vm3632_vm2, %v3631_v10 }
 0x505   : > { %v988_v43 = vpop.f32.mrb[4].mxu1 }
 0x506   : > { %v2798_v44 = vpop.f32.mrb[5].mxu1  ;;  %v1138_v45 = vsel %vm947_vm3, %v988_v43, -inf }
 0x507   : > { %1139 = vmax.xlane.f32.xlu1 %v1138_v45  ;;  %v991_v46 = vpop.f32.mrb[6].mxu1 }
 0x508   : > { %v2799_v47 = vpop.f32.mrb[7].mxu1 }
 0x570   : > { %v1036_v48 = vpop.f32.mrb[0].mxu0 }
 0x571   : > { %v2804_v49 = vpop.f32.mrb[1].mxu0  ;;  %v1141_v50 = vsel %vm947_vm3, %v1036_v48, -inf }
 0x572   : > { %1142 = vmax.xlane.f32.xlu0 %v1141_v50  ;;  %v1039_v51 = vpop.f32.mrb[2].mxu0 }
 0x573   : > { %v2805_v52 = vpop.f32.mrb[3].mxu0 }
 0x574   : > { %v1084_v53 = vpop.f32.mrb[8].mxu1 }
 0x575   : > { %v2810_v54 = vpop.f32.mrb[9].mxu1  ;;  %v1144_v55 = vsel %vm947_vm3, %v1084_v53, -inf }
 0x576   : > { %1145 = vmax.xlane.f32.xlu0 %v1144_v55  ;;  %v1087_v56 = vpop.f32.mrb[10].mxu1  ;;  %v4340_v54 = vld [vmem:[%s666_s26 + $0x8] sm:$0xff]  }
 0x577   : > { %v2811_v57 = vpop.f32.mrb[11].mxu1 }
 0x578   : > { %v1132_v58 = vpop.f32.mrb[4].mxu0 }
 0x579   : > { %v2816_v59 = vpop.f32.mrb[5].mxu0  ;;  %v1147_v60 = vsel %vm947_vm3, %v1132_v58, -inf }
 0x57a   : > { %v1135_v61 = vpop.f32.mrb[6].mxu0  ;;  %1148 = vmax.xlane.f32.xlu1 %v1147_v60 }
 0x57b   : > { %v2817_v62 = vpop.f32.mrb[7].mxu0 }
 0x58b   : > { %1235 = vrot.lane.b32.xlu1 %v940_v29, %s3637_s29 }
 0x58c   : > { %1186 = vrot.lane.b32.xlu0 %v4255_v24, %s3637_s29 }
 0x594   : > { %v1140_v63 = vpop.xlane.xlu1 %1139 }
 0x595   : > { %v1150_v0 = vsub.f32 %v988_v43, %v1140_v63 }
 0x597   : > { %v1154_v1 = vmul.f32 1.442695, %v1150_v0 }
 0x599   : > { %3105 = vpow2.f32 %v1154_v1 }
 0x5a3   : > { %v3106_v3 = vpop.eup %3105 }
 0x5a4   : > { %v1162_v4 = vsel %vm947_vm3, %v3106_v3, 0.0 }
 0x5ab   : > { %1163 = vadd.xlane.f32.xlu0 %v1162_v4 }
 0x5ff   : > { %v1143_v5 = vpop.xlane.xlu0 %1142 }
 0x600   : > { %v1151_v6 = vsub.f32 %v1036_v48, %v1143_v5 }
 0x602   : > { %v1156_v7 = vmul.f32 1.442695, %v1151_v6 }
 0x603   : > { %v1146_v8 = vpop.xlane.xlu0 %1145 }
 0x604   : > { %3107 = vpow2.f32 %v1156_v7  ;;  %v1152_v12 = vsub.f32 %v1084_v53, %v1146_v8  ;;  %v4334_v53 = vld [vmem:[%s666_s26] sm:$0xff]  }
 0x606   : > { %v1158_v13 = vmul.f32 1.442695, %v1152_v12 }
 0x607   : > { %v1149_v14 = vpop.xlane.xlu1 %1148  ;;  %v1187_v15 = vpop.permute.xlu0 %1186 }
 0x608   : > { %3109 = vpow2.f32 %v1158_v13  ;;  %v1153_v17 = vsub.f32 %v1132_v58, %v1149_v14  ;;  %v1193_v19 = vsel %vm1191_vm4, %v1187_v15, 0  ;;  %v4355_v14 = vld [vmem:[%s674_s11] ss:$0 sm:$0xff] }
 0x609   : > { %2819 = vmatpush3.bf16.msra.mxu1 %v1193_v19 }
 0x60a   : > { %v1160_v20 = vmul.f32 1.442695, %v1153_v17  ;;  %2830 = vmatprep.subr.bf16.mxu1 %v3631_v10 }
 0x60b   : > { %v1236_v21 = vpop.permute.xlu1 %1235 }
 0x60c   : > { %3111 = vpow2.f32 %v1160_v20  ;;  %v1241_v22 = vsel %vm1191_vm4, %v1236_v21, 0 }
 0x60d   : > { %2825 = vmatpush3.bf16.msra.mxu0 %v1241_v22 }
 0x60e   : > { %v3108_v23 = vpop.eup %3107  ;;  %2836 = vmatprep.subr.bf16.mxu0 %v3631_v10 }
 0x60f   : > { %v1165_v24 = vsel %vm947_vm3, %v3108_v23, 0.0 }
 0x610   : > { %1166 = vadd.xlane.f32.xlu1 %v1165_v24 }
 0x612   : > { %v3110_v25 = vpop.eup %3109 }
 0x613   : > { %v1168_v26 = vsel %vm947_vm3, %v3110_v25, 0.0 }
 0x614   : > { %1169 = vadd.xlane.f32.xlu0 %v1168_v26 }
 0x616   : > { %v3112_v27 = vpop.eup %3111 }
 0x617   : > { %v1171_v28 = vsel %vm947_vm3, %v3112_v27, 0.0 }
 0x618   : > { %1172 = vadd.xlane.f32.xlu1 %v1171_v28 }
 0x629   : > { %1283 = vrot.lane.b32.xlu1 %v4268_v30, %s3637_s29 }
 0x62a   : > { %1331 = vrot.lane.b32.xlu0 %v4272_v31, %s3637_s29 }
 0x638   : > { %v1164_v29 = vpop.xlane.xlu0 %1163 }
 0x639   : > { %3113 = vrcp.f32 %v1164_v29  ;;  %v4367_v29 = vld [vmem:[%s699_s12] sm:$0xff]  }
 0x643   : > { %v3114_v32 = vpop.eup %3113 }
 0x644   : > { %v1178_v33 = vmul.f32 %v3114_v32, %v3106_v3 }
 0x646   : > { %v1182_v34 = vpack.c.bf16 %v1178_v33, %v1178_v33 }
 0x648   : > { %2821 = vmatmul.mubr.msk.bf16.vlgmr.msra.gmra.mrb[12].mxu1 %vm947_vm3, %v1182_v34 }
 0x649   : > { %2832 = vmatprep.mubr.msk.bf16.mxu1 %vm3632_vm2, %v3631_v10 }
 0x69d   : > { %v1167_v35 = vpop.xlane.xlu1 %1166 }
 0x69e   : > { %3115 = vrcp.f32 %v1167_v35 }
 0x6a1   : > { %v1170_v36 = vpop.xlane.xlu0 %1169 }
 0x6a2   : > { %3117 = vrcp.f32 %v1170_v36  ;;  %v4378_v36 = vld [vmem:[%s682_s19] ss:$0 sm:$0xff] }
 0x6a5   : > { %v1173_v37 = vpop.xlane.xlu1 %1172  ;;  %v1332_v31 = vpop.permute.xlu0 %1331 }
 0x6a6   : > { %3119 = vrcp.f32 %v1173_v37  ;;  %v1337_v44 = vsel %vm1191_vm4, %v1332_v31, 0 }
 0x6a8   : > { %v3116_v30 = vpop.eup %3115 }
 0x6a9   : > { %v1179_v38 = vmul.f32 %v3116_v30, %v3108_v23  ;;  %v1284_v39 = vpop.permute.xlu1 %1283  ;;  %v4382_v30 = vld [vmem:[%s690_s28] ss:$0 sm:$0xff] }
 0x6aa   : > { %v1289_v40 = vsel %vm1191_vm4, %v1284_v39, 0 }
 0x6ab   : > { %2831 = vmatpush3.bf16.msra.mxu1 %v1289_v40  ;;  %v1183_v41 = vpack.c.bf16 %v1179_v38, %v1179_v38  ;;  %v4388_v40 = vld [vmem:[%s4209_s14] sm:$0xff]  }
 0x6ac   : > { %v3118_v42 = vpop.eup %3117  ;;  %2842 = vmatprep.subr.bf16.mxu1 %v3631_v10 }
 0x6ad   : > { %v1180_v43 = vmul.f32 %v3118_v42, %v3110_v25  ;;  %2827 = vmatmul.mubr.msk.bf16.vlgmr.msra.gmra.mrb[8].mxu0 %vm947_vm3, %v1183_v41  ;;  %v4393_v41 = vld [vmem:[%s4209_s14 + $0x8] sm:$0xff]   ;;  %v4398_v42 = vld [vmem:[%s4209_s14 + $0x10] sm:$0xff]  }
 0x6ae   : > { %2837 = vmatpush3.bf16.msra.mxu0 %v1337_v44  ;;  %2838 = vmatprep.mubr.msk.bf16.mxu0 %vm3632_vm2, %v3631_v10  ;;  %v4408_v44 = vld [vmem:[%s707_s21] ss:$0 sm:$0xff] }
 0x6af   : > { %v1184_v45 = vpack.c.bf16 %v1180_v43, %v1180_v43  ;;  %2850 = vmatprep.subr.bf16.mxu0 %v3631_v10  ;;  %v4403_v43 = vld [vmem:[%s4209_s14 + $0x18] sm:$0xff]  }
 0x6b0   : > { %v3120_v46 = vpop.eup %3119 }
 0x6b1   : > { %v1181_v47 = vmul.f32 %v3120_v46, %v3112_v27  ;;  %2833 = vmatmul.mubr.msk.bf16.vlgmr.msra.gmra.mrb[16].mxu1 %vm947_vm3, %v1184_v45 }
 0x6b2   : > { %2846 = vmatprep.mubr.msk.bf16.mxu1 %vm3632_vm2, %v3631_v10  ;;  %2843 = vmatpush3.bf16.msra.mxu1 %v4334_v53 }
 0x6b3   : > { %v1185_v48 = vpack.c.bf16 %v1181_v47, %v1181_v47  ;;  %2844 = vmatprep.subr.bf16.mxu1 %v3631_v10 }
 0x6b5   : > { %2839 = vmatmul.mubr.msk.bf16.vlgmr.msra.gmra.mrb[12].mxu0 %vm947_vm3, %v1185_v48 }
 0x6b6   : > { %2854 = vmatprep.mubr.msk.bf16.mxu0 %vm3632_vm2, %v3631_v10  ;;  %2845 = vmatpush3.bf16.msra.mxu1 %v4340_v54 }
 0x6b7   : > { %2858 = vmatprep.subr.bf16.mxu1 %v3631_v10  ;;  %2851 = vmatpush3.bf16.msra.mxu0 %v4367_v29 }
 0x6b8   : > { %2852 = vmatprep.subr.bf16.mxu0 %v3631_v10 }
 0x71b   : > { %v1229_v49 = vpop.f32.mrb[12].mxu1 }
 0x71c   : > { %v2822_v50 = vpop.f32.mrb[13].mxu1 }
 0x71d   : > { %v1232_v51 = vpop.f32.mrb[14].mxu1 }
 0x71e   : > { %v2823_v52 = vpop.f32.mrb[15].mxu1 }
 0x780   : > { %v1277_v55 = vpop.f32.mrb[8].mxu0 }
 0x781   : > { %1380 = vrot.lane.b32.xlu1 %v1277_v55, %s3638_s0  ;;  %v2828_v56 = vpop.f32.mrb[9].mxu0 }
 0x782   : > { %v1280_v57 = vpop.f32.mrb[10].mxu0 }
 0x783   : > { %v2829_v58 = vpop.f32.mrb[11].mxu0 }
 0x784   : > { %v1325_v59 = vpop.f32.mrb[16].mxu1 }
 0x785   : > { %1384 = vrot.lane.b32.xlu0 %v1325_v59, %s3639_s2  ;;  %v2834_v60 = vpop.f32.mrb[17].mxu1 }
 0x786   : > { %v1328_v61 = vpop.f32.mrb[18].mxu1 }
 0x787   : > { %v2835_v62 = vpop.f32.mrb[19].mxu1 }
 0x788   : > { %v1373_v63 = vpop.f32.mrb[12].mxu0 }
 0x789   : > { %1388 = vrot.lane.b32.xlu1 %v1373_v63, %s3640_s3  ;;  %v2840_v0 = vpop.f32.mrb[13].mxu0 }
 0x78a   : > { %v1376_v1 = vpop.f32.mrb[14].mxu0 }
 0x78b   : > { %v2841_v3 = vpop.f32.mrb[15].mxu0 }
 0x7f3   : > { %v1381_v4 = vpop.permute.xlu1 %1380 }
 0x7f4   : > { %v1391_v6 = vsel %vm947_vm3, %v1229_v49, %v1381_v4 }
 0x7f7   : > { %v1385_v5 = vpop.permute.xlu0 %1384 }
 0x7f8   : > { %v1393_v7 = vsel %vm1392_vm5, %v1391_v6, %v1385_v5 }
 0x7fb   : > { %v1389_v8 = vpop.permute.xlu1 %1388 }
 0x7fc   : > { %v1395_v12 = vsel %vm1394_vm6, %v1393_v7, %v1389_v8 }
 0x7fd   : > { %v1396_v13 = vpack.c.bf16 %v1395_v12, %v1395_v12  ;;  %v3641_v12 = vmov -1.0  }
 0x7ff   : > { %2847 = vmatmul.mubr.msk.bf16.vlgmr.msra.gmra.mrb[20].mxu1 %vm843_vm1, %v1396_v13 }
 0x800   : > { %2866 = vmatprep.mubr.msk.bf16.mxu1 %vm3632_vm2, %v3631_v10  ;;  %2859 = vmatpush3.bf16.msra.mxu1 %v4388_v40 }
 0x801   : > { %2860 = vmatprep.subr.bf16.mxu1 %v3631_v10 }
 0x804   : > { %2861 = vmatpush3.bf16.msra.mxu1 %v4393_v41 }
 0x805   : > { %2862 = vmatprep.subr.bf16.mxu1 %v3631_v10 }
 0x808   : > { %2863 = vmatpush3.bf16.msra.mxu1 %v4398_v42 }
 0x809   : > { %2864 = vmatprep.subr.bf16.mxu1 %v3631_v10 }
 0x80c   : > { %2865 = vmatpush3.bf16.msra.mxu1 %v4403_v43 }
 0x8d2   : > { %v1452_v15 = vpop.f32.mrb[20].mxu1 }
 0x8d3   : > { %v1453_v17 = vadd.f32 %v4355_v14, %v1452_v15  ;;  %v2848_v19 = vpop.f32.mrb[21].mxu1 }
 0x8d4   : > { %v1455_v20 = vpop.f32.mrb[22].mxu1 }
 0x8d5   : > { %v4359_v21 = vadd.f32 %v1453_v17, %v4218_v2  ;;  %v2849_v22 = vpop.f32.mrb[23].mxu1  ;;  %v4372_v2 = vld [vmem:[%s699_s12 + $0x8] sm:$0xff]  }
 0x8d6   : > { %2853 = vmatpush3.bf16.msra.mxu0 %v4372_v2 }
 0x8d7   : > { %v1459_v23 = vsel %vm843_vm1, %v4359_v21, 0.0 }
 0x8d8   : > { %1460 = vadd.xlane.f32.xlu0 %v1459_v23  ;;  %v4415_v23 = vld [vmem:[%s724_s9] ss:$0 sm:$0xff] }
 0x965   : > { %v1461_v24 = vpop.xlane.xlu0 %1460 }
 0x966   : > { %v1462_v25 = vmul.f32 0.03125, %v1461_v24 }
 0x968   : > { %v1463_v26 = vsub.f32 %v4359_v21, %v1462_v25 }
 0x96a   : > { %v1464_v27 = vmul.f32 %v1463_v26, %v1463_v26 }
 0x96c   : > { %v1465_v28 = vsel %vm843_vm1, %v1464_v27, 0.0 }
 0x96d   : > { %1466 = vadd.xlane.f32.xlu1 %v1465_v28 }
 0x9fa   : > { %v1467_v32 = vpop.xlane.xlu1 %1466 }
 0x9fb   : > { %v1468_v33 = vmul.f32 0.03125, %v1467_v32 }
 0x9fd   : > { %v1469_v34 = vadd.f32 1e-05, %v1468_v33 }
 0x9ff   : > { %3121 = vrsqrt.f32 %v1469_v34 }
 0xa09   : > { %v3122_v35 = vpop.eup %3121 }
 0xa0a   : > { %v1471_v37 = vmul.f32 %v3122_v35, %v1463_v26 }
 0xa0c   : > { %v1478_v38 = vmul.f32 %v4378_v36, %v1471_v37 }
 0xa0e   : > { %v1485_v39 = vadd.f32 %v4382_v30, %v1478_v38 }
 0xa10   : > { %v1486_v31 = vpack.c.bf16 %v1485_v39, %v1485_v39 }
 0xa12   : > { %2855 = vmatmul.mubr.msk.bf16.vlgmr.msra.gmra.mrb[16].mxu0 %vm843_vm1, %v1486_v31 }
 0xae5   : > { %v1542_v45 = vpop.f32.mrb[16].mxu0 }
 0xae6   : > { %v1543_v46 = vadd.f32 %v4408_v44, %v1542_v45  ;;  %v2856_v47 = vpop.f32.mrb[17].mxu0 }
 0xae7   : > { %v1545_v48 = vpop.f32.mrb[18].mxu0 }
 0xae8   : > { %v1549_v49 = vmul.f32 0.70710677, %v1543_v46  ;;  %v2857_v50 = vpop.f32.mrb[19].mxu0  ;;  %v1548_v17 = vmul.f32 0.5, %v1543_v46 }
 0xaea   : > { %v1552_v51 = vand.u32 2147483647, %v1549_v49  ;;  %vm1550_vm7 = vcmp.ge.f32.partialorder %v1549_v49, 0.0 }
 0xaeb   : > { %v1551_v13 = vsel %vm1550_vm7, 1.0, %v3641_v12 }
 0xaec   : > { %v1553_v52 = vmul.f32 0.3275911, %v1552_v51  ;;  %v1566_v56 = vsub.f32 0.0, %v1552_v51 }
 0xaee   : > { %v1554_v55 = vadd.f32 1.0, %v1553_v52  ;;  %v1567_v58 = vmul.f32 %v1566_v56, %v1552_v51 }
 0xaf0   : > { %3123 = vrcp.f32 %v1554_v55  ;;  %v1568_v61 = vmul.f32 1.442695, %v1567_v58 }
 0xaf2   : > { %3125 = vpow2.f32 %v1568_v61 }
 0xafa   : > { %v3124_v57 = vpop.eup %3123 }
 0xafb   : > { %v1557_v59 = vmul.f32 1.0614054, %v3124_v57 }
 0xafc   : > { %v3126_v6 = vpop.eup %3125 }
 0xafd   : > { %v1558_v60 = vadd.f32 -1.4531521, %v1557_v59 }
 0xaff   : > { %v1559_v62 = vmul.f32 %v3124_v57, %v1558_v60 }
 0xb01   : > { %v1560_v63 = vadd.f32 1.4214138, %v1559_v62 }
 0xb03   : > { %v1561_v0 = vmul.f32 %v3124_v57, %v1560_v63 }
 0xb05   : > { %v1562_v1 = vadd.f32 -0.28449672, %v1561_v0 }
 0xb07   : > { %v1563_v3 = vmul.f32 %v3124_v57, %v1562_v1 }
 0xb09   : > { %v1564_v4 = vadd.f32 0.2548296, %v1563_v3 }
 0xb0b   : > { %v1565_v5 = vmul.f32 %v3124_v57, %v1564_v4 }
 0xb0d   : > { %v1570_v7 = vmul.f32 %v3126_v6, %v1565_v5 }
 0xb0f   : > { %v1571_v8 = vsub.f32 1.0, %v1570_v7 }
 0xb11   : > { %v1572_v15 = vmul.f32 %v1571_v8, %v1551_v13 }
 0xb13   : > { %v1573_v19 = vadd.f32 1.0, %v1572_v15 }
 0xb15   : > { %v1574_v20 = vmul.f32 %v1573_v19, %v1548_v17 }
 0xb17   : > { %v1575_v22 = vpack.c.bf16 %v1574_v20, %v1574_v20 }
 0xb19   : > { %2867 = vmatmul.mubr.msk.bf16.vlgmr.msra.gmra.mrb[24].mxu1 %vm1606_vm8, %v1575_v22 }
 0xbeb   : > { %1655 = sbr.rel (%p2704_p8) target bundleno = 3058 (0xbf2), region = 124 }
 0xbec   : > { %v1644_v24 = vpop.f32.mrb[24].mxu1 }
 0xbed   : > { %v1645_v25 = vadd.f32 %v4415_v23, %v1644_v24  ;;  %v2868_v26 = vpop.f32.mrb[25].mxu1 }
 0xbee   : > { %v1647_v27 = vpop.f32.mrb[26].mxu1 }
 0xbef   : > { %v1650_v28 = vadd.f32 %v1645_v25, %v4359_v21  ;;  %v2869_v32 = vpop.f32.mrb[27].mxu1 }
 0xbf1   : > { %1651 = vst.msk [vmem:[#allocation2] sm:$0xff] %vm843_vm1, %v1650_v28  ;;  %1656 = vst.msk [vmem:[#allocation23] sm:$0xff] (!%p2704_p8), %vm843_vm1, %v1650_v28 }
 0xbf2 PF: > { %v4424_v33 = vld [vmem:[#allocation2 + $0x8] sm:$0xff]  ;;  %2870 = vmatprep.subr.bf16.mxu0 %v3631_v10  ;;  %2874 = vmatprep.mubr.msk.bf16.mxu0 %vm3632_vm2, %v3631_v10 }
 0xbf3   : > { %v1659_v21 = vsel %vm843_vm1, %v4424_v33, 0.0  ;;  %2871 = vmatpush3.bf16.msra.mxu0 %v4226_v9  ;;  %2884 = vmatprep.subr.bf16.mxu1 %v3631_v10 }
 0xbf4   : > { %1660 = vadd.xlane.f32.xlu0 %v1659_v21  ;;  %2872 = vmatprep.subr.bf16.mxu0 %v3631_v10 }
 0xbf5   : > { %2886 = vmatprep.mubr.msk.bf16.mxu1 %vm3632_vm2, %v3631_v10 }
 0xbf7   : > { %2873 = vmatpush3.bf16.msra.mxu0 %v4234_v11 }
 0xbf8   : > { %2878 = vmatprep.subr.bf16.mxu0 %v3631_v10 }
 0xc81   : > { %v1661_v34 = vpop.xlane.xlu0 %1660 }
 0xc82   : > { %v1662_v35 = vmul.f32 0.03125, %v1661_v34 }
 0xc84   : > { %v1663_v37 = vsub.f32 %v4424_v33, %v1662_v35 }
 0xc86   : > { %v1664_v38 = vmul.f32 %v1663_v37, %v1663_v37 }
 0xc88   : > { %v1665_v39 = vsel %vm843_vm1, %v1664_v38, 0.0 }
 0xc89   : > { %1666 = vadd.xlane.f32.xlu0 %v1665_v39 }
 0xd16   : > { %v1667_v9 = vpop.xlane.xlu0 %1666 }
 0xd17   : > { %v1668_v31 = vmul.f32 0.03125, %v1667_v9 }
 0xd19   : > { %v1669_v45 = vadd.f32 1e-05, %v1668_v31 }
 0xd1b   : > { %3127 = vrsqrt.f32 %v1669_v45 }
 0xd25   : > { %v3128_v46 = vpop.eup %3127 }
 0xd26   : > { %v1671_v47 = vmul.f32 %v3128_v46, %v1663_v37 }
 0xd28   : > { %v1672_v48 = vmul.f32 %v4244_v16, %v1671_v47 }
 0xd2a   : > { %v1673_v11 = vadd.f32 %v4248_v18, %v1672_v48 }
 0xd2c   : > { %v1674_v49 = vpack.c.bf16 %v1673_v11, %v1673_v11 }
 0xd2e   : > { %2875 = vmatmul.mubr.msk.bf16.vlgmr.msra.gmra.mrb[20].mxu0 %vm843_vm1, %v1674_v49 }
 0xd2f   : > { %2880 = vmatprep.mubr.msk.bf16.mxu0 %vm3632_vm2, %v3631_v10 }
 0xe01   : > { %v1712_v50 = vpop.f32.mrb[20].mxu0 }
 0xe02   : > { %v1718_v51 = vmul.f32 0.35355338, %v1712_v50  ;;  %v4445_v52 = vpack.c.bf16 %v1712_v50, %v1712_v50  ;;  %v2876_v55 = vpop.f32.mrb[21].mxu0 }
 0xe03   : > { %v1715_v56 = vpop.f32.mrb[22].mxu0 }
 0xe04   : > { %1733 = vrot.lane.b32.xlu0 %v4445_v52, %s3633_s17  ;;  %1729 = vrot.lane.b32.xlu1 %v4445_v52, %s3634_s10  ;;  %v2877_v16 = vpop.f32.mrb[23].mxu0  ;;  %v1719_v18 = vpack.c.bf16 %v1718_v51, %v1718_v51 }
 0xe08   : > { %1731 = vrot.lane.b32.xlu1 %v4445_v52, %s3635_s16  ;;  %1726 = vrot.lane.b32.xlu0 %v1719_v18, %s3633_s17 }
 0xe0c   : > { %1735 = vrot.lane.b32.xlu1 %v4445_v52, %s3636_s18 }
 0xe10   : > { %1722 = vrot.lane.b32.xlu1 %v1719_v18, %s3634_s10 }
 0xe76   : > { %v1730_v57 = vpop.permute.xlu1 %1729  ;;  %v4462_v59 = vpop.permute.xlu0 %1733 }
 0xe77   : > { %1783 = vrot.lane.b32.xlu1 %v1730_v57, %s3636_s18 }
 0xe7a   : > { %v4458_v58 = vpop.permute.xlu1 %1731  ;;  %v1727_v7 = vpop.permute.xlu0 %1726 }
 0xe7b   : > { %1831 = vrot.lane.b32.xlu1 %v4458_v58, %s3636_s18 }
 0xe7e   : > { %v1736_v60 = vpop.permute.xlu1 %1735 }
 0xe7f   : > { %v1741_v61 = vsel %vm947_vm3, %v1736_v60, 0  ;;  %1879 = vrot.lane.b32.xlu1 %v4462_v59, %s3636_s18 }
 0xe80   : > { %2879 = vmatpush3.bf16.xpose.msra.mxu0 %v1741_v61 }
 0xe81   : > { %2890 = vmatprep.subr.bf16.mxu0 %v3631_v10 }
 0xe82   : > { %v1723_v62 = vpop.permute.xlu1 %1722 }
 0xe83   : > { %1724 = vrot.lane.b32.xlu1 %v1719_v18, %s3635_s16 }
 0xe87   : > { %2881 = vmatmul.mubr.msk.bf16.vlgmr.msra.gmra.mrb[24].mxu0 %vm947_vm3, %v1719_v18 }
 0xe88   : > { %2892 = vmatprep.mubr.msk.bf16.mxu0 %vm3632_vm2, %v3631_v10 }
 0xee9   : > { %v1784_v63 = vpop.permute.xlu1 %1783 }
 0xeea   : > { %v1789_v0 = vsel %vm947_vm3, %v1784_v63, 0 }
 0xeeb   : > { %2885 = vmatpush3.bf16.xpose.msra.mxu1 %v1789_v0 }
 0xeec   : > { %2896 = vmatprep.subr.bf16.mxu1 %v3631_v10 }
 0xeed   : > { %v1832_v1 = vpop.permute.xlu1 %1831 }
 0xeee   : > { %v1837_v3 = vsel %vm947_vm3, %v1832_v1, 0 }
 0xeef   : > { %2891 = vmatpush3.bf16.xpose.msra.mxu0 %v1837_v3 }
 0xef0   : > { %2902 = vmatprep.subr.bf16.mxu0 %v3631_v10 }
 0xef1   : > { %v1880_v4 = vpop.permute.xlu1 %1879 }
 0xef2   : > { %v1885_v5 = vsel %vm947_vm3, %v1880_v4, 0  ;;  %2887 = vmatmul.mubr.msk.bf16.vlgmr.msra.gmra.mrb[28].mxu1 %vm947_vm3, %v1723_v62 }
 0xef3   : > { %2897 = vmatpush3.bf16.xpose.msra.mxu1 %v1885_v5  ;;  %2898 = vmatprep.mubr.msk.bf16.mxu1 %vm3632_vm2, %v3631_v10 }
 0xef4   : > { %2908 = vmatprep.subr.bf16.mxu1 %v3631_v10 }
 0xef5   : > { %v1725_v6 = vpop.permute.xlu1 %1724 }
 0xef6   : > { %2893 = vmatmul.mubr.msk.bf16.vlgmr.msra.gmra.mrb[28].mxu0 %vm947_vm3, %v1725_v6 }
 0xef7   : > { %2904 = vmatprep.mubr.msk.bf16.mxu0 %vm3632_vm2, %v3631_v10 }
 0xefa   : > { %2899 = vmatmul.mubr.msk.bf16.vlgmr.msra.gmra.mrb[32].mxu1 %vm947_vm3, %v1727_v7 }
 0xefb   : > { %2910 = vmatprep.mubr.msk.bf16.mxu1 %vm3632_vm2, %v3631_v10 }
 0xf5a   : > { %v1777_v8 = vpop.f32.mrb[24].mxu0 }
 0xf5b   : > { %v2882_v13 = vpop.f32.mrb[25].mxu0  ;;  %v1927_v15 = vsel %vm947_vm3, %v1777_v8, -inf }
 0xf5c   : > { %1928 = vmax.xlane.f32.xlu1 %v1927_v15  ;;  %v1780_v17 = vpop.f32.mrb[26].mxu0 }
 0xf5d   : > { %v2883_v19 = vpop.f32.mrb[27].mxu0 }
 0xfc5   : > { %v1825_v20 = vpop.f32.mrb[28].mxu1 }
 0xfc6   : > { %v2888_v22 = vpop.f32.mrb[29].mxu1  ;;  %v1930_v24 = vsel %vm947_vm3, %v1825_v20, -inf }
 0xfc7   : > { %1931 = vmax.xlane.f32.xlu0 %v1930_v24  ;;  %v1828_v25 = vpop.f32.mrb[30].mxu1 }
 0xfc8   : > { %v2889_v26 = vpop.f32.mrb[31].mxu1 }
 0xfc9   : > { %v1873_v27 = vpop.f32.mrb[28].mxu0 }
 0xfca   : > { %v2894_v28 = vpop.f32.mrb[29].mxu0  ;;  %v1933_v32 = vsel %vm947_vm3, %v1873_v27, -inf }
 0xfcb   : > { %1934 = vmax.xlane.f32.xlu0 %v1933_v32  ;;  %v1876_v21 = vpop.f32.mrb[30].mxu0 }
 0xfcc   : > { %v2895_v34 = vpop.f32.mrb[31].mxu0 }
 0xfcd   : > { %v1921_v35 = vpop.f32.mrb[32].mxu1 }
 0xfce   : > { %v2900_v37 = vpop.f32.mrb[33].mxu1  ;;  %v1936_v38 = vsel %vm947_vm3, %v1921_v35, -inf }
 0xfcf   : > { %v1924_v39 = vpop.f32.mrb[34].mxu1  ;;  %1937 = vmax.xlane.f32.xlu1 %v1936_v38 }
 0xfd0   : > { %v2901_v9 = vpop.f32.mrb[35].mxu1 }
 0xfe0   : > { %2023 = vrot.lane.b32.xlu1 %v1730_v57, %s3637_s29 }
 0xfe1   : > { %1975 = vrot.lane.b32.xlu0 %v4445_v52, %s3637_s29 }
 0xfe9   : > { %v1929_v31 = vpop.xlane.xlu1 %1928 }
 0xfea   : > { %v1939_v45 = vsub.f32 %v1777_v8, %v1929_v31 }
 0xfec   : > { %v1943_v46 = vmul.f32 1.442695, %v1939_v45 }
 0xfee   : > { %3129 = vpow2.f32 %v1943_v46 }
 0xff8   : > { %v3130_v47 = vpop.eup %3129 }
 0xff9   : > { %v1951_v48 = vsel %vm947_vm3, %v3130_v47, 0.0 }
0x1000   : > { %1952 = vadd.xlane.f32.xlu0 %v1951_v48 }
0x1054   : > { %v1932_v11 = vpop.xlane.xlu0 %1931 }
0x1055   : > { %v1940_v49 = vsub.f32 %v1825_v20, %v1932_v11 }
0x1057   : > { %v1945_v50 = vmul.f32 1.442695, %v1940_v49 }
0x1058   : > { %v1935_v51 = vpop.xlane.xlu0 %1934 }
0x1059   : > { %3131 = vpow2.f32 %v1945_v50  ;;  %v1941_v55 = vsub.f32 %v1873_v27, %v1935_v51 }
0x105b   : > { %v1947_v56 = vmul.f32 1.442695, %v1941_v55 }
0x105c   : > { %v1938_v16 = vpop.xlane.xlu1 %1937  ;;  %v1976_v18 = vpop.permute.xlu0 %1975 }
0x105d   : > { %3133 = vpow2.f32 %v1947_v56  ;;  %v1942_v57 = vsub.f32 %v1921_v35, %v1938_v16  ;;  %v1981_v52 = vsel %vm1191_vm4, %v1976_v18, 0 }
0x105e   : > { %2903 = vmatpush3.bf16.msra.mxu0 %v1981_v52 }
0x105f   : > { %v1949_v60 = vmul.f32 1.442695, %v1942_v57  ;;  %2914 = vmatprep.subr.bf16.mxu0 %v3631_v10 }
0x1060   : > { %v2024_v61 = vpop.permute.xlu1 %2023 }
0x1061   : > { %3135 = vpow2.f32 %v1949_v60  ;;  %v2029_v62 = vsel %vm1191_vm4, %v2024_v61, 0 }
0x1062   : > { %2909 = vmatpush3.bf16.msra.mxu1 %v2029_v62 }
0x1063   : > { %v3132_v63 = vpop.eup %3131  ;;  %2920 = vmatprep.subr.bf16.mxu1 %v3631_v10 }
0x1064   : > { %v1954_v0 = vsel %vm947_vm3, %v3132_v63, 0.0 }
0x1065   : > { %1955 = vadd.xlane.f32.xlu1 %v1954_v0 }
0x1067   : > { %v3134_v1 = vpop.eup %3133 }
0x1068   : > { %v1957_v3 = vsel %vm947_vm3, %v3134_v1, 0.0 }
0x1069   : > { %1958 = vadd.xlane.f32.xlu0 %v1957_v3 }
0x106b   : > { %v3136_v4 = vpop.eup %3135 }
0x106c   : > { %v1960_v5 = vsel %vm947_vm3, %v3136_v4, 0.0 }
0x106d   : > { %1961 = vadd.xlane.f32.xlu1 %v1960_v5 }
0x107e   : > { %2071 = vrot.lane.b32.xlu1 %v4458_v58, %s3637_s29 }
0x107f   : > { %2119 = vrot.lane.b32.xlu0 %v4462_v59, %s3637_s29 }
0x108d   : > { %v1953_v6 = vpop.xlane.xlu0 %1952 }
0x108e   : > { %3137 = vrcp.f32 %v1953_v6 }
0x1098   : > { %v3138_v7 = vpop.eup %3137 }
0x1099   : > { %v1967_v8 = vmul.f32 %v3138_v7, %v3130_v47 }
0x109b   : > { %v1971_v13 = vpack.c.bf16 %v1967_v8, %v1967_v8 }
0x109d   : > { %2905 = vmatmul.mubr.msk.bf16.vlgmr.msra.gmra.mrb[32].mxu0 %vm947_vm3, %v1971_v13 }
0x109e   : > { %2916 = vmatprep.mubr.msk.bf16.mxu0 %vm3632_vm2, %v3631_v10 }
0x10f2   : > { %v1956_v15 = vpop.xlane.xlu1 %1955 }
0x10f3   : > { %3139 = vrcp.f32 %v1956_v15 }
0x10f6   : > { %v1959_v17 = vpop.xlane.xlu0 %1958 }
0x10f7   : > { %3141 = vrcp.f32 %v1959_v17 }
0x10fa   : > { %v1962_v19 = vpop.xlane.xlu1 %1961  ;;  %v2120_v59 = vpop.permute.xlu0 %2119 }
0x10fb   : > { %3143 = vrcp.f32 %v1962_v19  ;;  %v2125_v27 = vsel %vm1191_vm4, %v2120_v59, 0 }
0x10fd   : > { %v3140_v58 = vpop.eup %3139 }
0x10fe   : > { %v2072_v20 = vpop.permute.xlu1 %2071  ;;  %v1968_v22 = vmul.f32 %v3140_v58, %v3132_v63 }
0x10ff   : > { %v2077_v24 = vsel %vm1191_vm4, %v2072_v20, 0 }
0x1100   : > { %2915 = vmatpush3.bf16.msra.mxu0 %v2077_v24  ;;  %v1972_v25 = vpack.c.bf16 %v1968_v22, %v1968_v22 }
0x1101   : > { %v3142_v26 = vpop.eup %3141  ;;  %2926 = vmatprep.subr.bf16.mxu0 %v3631_v10 }
0x1102   : > { %2911 = vmatmul.mubr.msk.bf16.vlgmr.msra.gmra.mrb[36].mxu1 %vm947_vm3, %v1972_v25  ;;  %v1969_v28 = vmul.f32 %v3142_v26, %v3134_v1 }
0x1103   : > { %2921 = vmatpush3.bf16.msra.mxu1 %v2125_v27  ;;  %2922 = vmatprep.mubr.msk.bf16.mxu1 %vm3632_vm2, %v3631_v10 }
0x1104   : > { %v1973_v32 = vpack.c.bf16 %v1969_v28, %v1969_v28  ;;  %2934 = vmatprep.subr.bf16.mxu1 %v3631_v10 }
0x1105   : > { %v3144_v21 = vpop.eup %3143 }
0x1106   : > { %2917 = vmatmul.mubr.msk.bf16.vlgmr.msra.gmra.mrb[36].mxu0 %vm947_vm3, %v1973_v32  ;;  %v1970_v34 = vmul.f32 %v3144_v21, %v3136_v4 }
0x1107   : > { %2927 = vmatpush3.bf16.msra.mxu0 %v4334_v53  ;;  %2930 = vmatprep.mubr.msk.bf16.mxu0 %vm3632_vm2, %v3631_v10 }
0x1108   : > { %v1974_v35 = vpack.c.bf16 %v1970_v34, %v1970_v34  ;;  %2928 = vmatprep.subr.bf16.mxu0 %v3631_v10 }
0x110a   : > { %2923 = vmatmul.mubr.msk.bf16.vlgmr.msra.gmra.mrb[40].mxu1 %vm947_vm3, %v1974_v35 }
0x110b   : > { %2929 = vmatpush3.bf16.msra.mxu0 %v4340_v54  ;;  %2935 = vmatpush3.bf16.msra.mxu1 %v4367_v29 }
0x110c   : > { %2936 = vmatprep.subr.bf16.mxu1 %v3631_v10  ;;  %2938 = vmatprep.mubr.msk.bf16.mxu1 %vm3632_vm2, %v3631_v10 }
0x110d   : > { %2942 = vmatprep.subr.bf16.mxu0 %v3631_v10 }
0x110f   : > { %2937 = vmatpush3.bf16.msra.mxu1 %v4372_v2 }
0x1170   : > { %v2017_v53 = vpop.f32.mrb[32].mxu0 }
0x1171   : > { %v2906_v37 = vpop.f32.mrb[33].mxu0 }
0x1172   : > { %v2020_v38 = vpop.f32.mrb[34].mxu0 }
0x1173   : > { %v2907_v39 = vpop.f32.mrb[35].mxu0 }
0x11d5   : > { %v2065_v9 = vpop.f32.mrb[36].mxu1 }
0x11d6   : > { %2168 = vrot.lane.b32.xlu1 %v2065_v9, %s3638_s0  ;;  %v2912_v31 = vpop.f32.mrb[37].mxu1 }
0x11d7   : > { %v2068_v54 = vpop.f32.mrb[38].mxu1 }
0x11d8   : > { %v2913_v45 = vpop.f32.mrb[39].mxu1 }
0x11d9   : > { %v2113_v29 = vpop.f32.mrb[36].mxu0 }
0x11da   : > { %2172 = vrot.lane.b32.xlu0 %v2113_v29, %s3639_s2  ;;  %v2918_v46 = vpop.f32.mrb[37].mxu0 }
0x11db   : > { %v2116_v47 = vpop.f32.mrb[38].mxu0 }
0x11dc   : > { %v2919_v48 = vpop.f32.mrb[39].mxu0 }
0x11dd   : > { %v2161_v11 = vpop.f32.mrb[40].mxu1 }
0x11de   : > { %2176 = vrot.lane.b32.xlu1 %v2161_v11, %s3640_s3  ;;  %v2924_v2 = vpop.f32.mrb[41].mxu1 }
0x11df   : > { %v2164_v49 = vpop.f32.mrb[42].mxu1 }
0x11e0   : > { %v2925_v50 = vpop.f32.mrb[43].mxu1 }
0x1248   : > { %v2169_v51 = vpop.permute.xlu1 %2168 }
0x1249   : > { %v2179_v56 = vsel %vm947_vm3, %v2017_v53, %v2169_v51 }
0x124c   : > { %v2173_v55 = vpop.permute.xlu0 %2172 }
0x124d   : > { %v2180_v16 = vsel %vm1392_vm5, %v2179_v56, %v2173_v55 }
0x1250   : > { %v2177_v18 = vpop.permute.xlu1 %2176 }
0x1251   : > { %v2181_v57 = vsel %vm1394_vm6, %v2180_v16, %v2177_v18 }
0x1252   : > { %v2182_v52 = vpack.c.bf16 %v2181_v57, %v2181_v57 }
0x1254   : > { %2931 = vmatmul.mubr.msk.bf16.vlgmr.msra.gmra.mrb[40].mxu0 %vm843_vm1, %v2182_v52 }
0x1255   : > { %2943 = vmatpush3.bf16.msra.mxu0 %v4388_v40  ;;  %2950 = vmatprep.mubr.msk.bf16.mxu0 %vm3632_vm2, %v3631_v10 }
0x1256   : > { %2944 = vmatprep.subr.bf16.mxu0 %v3631_v10 }
0x1259   : > { %2945 = vmatpush3.bf16.msra.mxu0 %v4393_v41 }
0x125a   : > { %2946 = vmatprep.subr.bf16.mxu0 %v3631_v10 }
0x125d   : > { %2947 = vmatpush3.bf16.msra.mxu0 %v4398_v42 }
0x125e   : > { %2948 = vmatprep.subr.bf16.mxu0 %v3631_v10 }
0x1261   : > { %2949 = vmatpush3.bf16.msra.mxu0 %v4403_v43 }
0x1327   : > { %v2220_v60 = vpop.f32.mrb[40].mxu0 }
0x1328   : > { %v2221_v61 = vadd.f32 %v4355_v14, %v2220_v60  ;;  %v2932_v62 = vpop.f32.mrb[41].mxu0 }
0x1329   : > { %v2223_v40 = vpop.f32.mrb[42].mxu0 }
0x132a   : > { %v2226_v63 = vadd.f32 %v2221_v61, %v4424_v33  ;;  %v2933_v0 = vpop.f32.mrb[43].mxu0 }
0x132c   : > { %v2227_v1 = vsel %vm843_vm1, %v2226_v63, 0.0 }
0x132d   : > { %2228 = vadd.xlane.f32.xlu0 %v2227_v1 }
0x13ba   : > { %v2229_v41 = vpop.xlane.xlu0 %2228 }
0x13bb   : > { %v2230_v3 = vmul.f32 0.03125, %v2229_v41 }
0x13bd   : > { %v2231_v4 = vsub.f32 %v2226_v63, %v2230_v3 }
0x13bf   : > { %v2232_v5 = vmul.f32 %v2231_v4, %v2231_v4 }
0x13c1   : > { %v2233_v42 = vsel %vm843_vm1, %v2232_v5, 0.0 }
0x13c2   : > { %2234 = vadd.xlane.f32.xlu1 %v2233_v42 }
0x144f   : > { %v2235_v10 = vpop.xlane.xlu1 %2234 }
0x1450   : > { %v2236_v43 = vmul.f32 0.03125, %v2235_v10 }
0x1452   : > { %v2237_v6 = vadd.f32 1e-05, %v2236_v43 }
0x1454   : > { %3145 = vrsqrt.f32 %v2237_v6 }
0x145e   : > { %v3146_v14 = vpop.eup %3145 }
0x145f   : > { %v2239_v7 = vmul.f32 %v3146_v14, %v2231_v4 }
0x1461   : > { %v2240_v8 = vmul.f32 %v4378_v36, %v2239_v7 }
0x1463   : > { %v2241_v33 = vadd.f32 %v4382_v30, %v2240_v8 }
0x1465   : > { %v2242_v13 = vpack.c.bf16 %v2241_v33, %v2241_v33 }
0x1467   : > { %2939 = vmatmul.mubr.msk.bf16.vlgmr.msra.gmra.mrb[44].mxu1 %vm843_vm1, %v2242_v13 }
0x153a   : > { %v2280_v15 = vpop.f32.mrb[44].mxu1 }
0x153b   : > { %v2281_v17 = vadd.f32 %v4408_v44, %v2280_v15  ;;  %v2940_v19 = vpop.f32.mrb[45].mxu1 }
0x153c   : > { %v2283_v58 = vpop.f32.mrb[46].mxu1 }
0x153d   : > { %v2287_v20 = vmul.f32 0.70710677, %v2281_v17  ;;  %v2941_v22 = vpop.f32.mrb[47].mxu1  ;;  %v2286_v29 = vmul.f32 0.5, %v2281_v17 }
0x153f   : > { %v2290_v59 = vand.u32 2147483647, %v2287_v20  ;;  %vm2288_vm9 = vcmp.ge.f32.partialorder %v2287_v20, 0.0 }
0x1540   : > { %v2289_v54 = vsel %vm2288_vm9, 1.0, %v3641_v12 }
0x1541   : > { %v2291_v24 = vmul.f32 0.3275911, %v2290_v59  ;;  %v2304_v26 = vsub.f32 0.0, %v2290_v59 }
0x1543   : > { %v2292_v25 = vadd.f32 1.0, %v2291_v24  ;;  %v2305_v28 = vmul.f32 %v2304_v26, %v2290_v59 }
0x1545   : > { %3147 = vrcp.f32 %v2292_v25  ;;  %v2306_v30 = vmul.f32 1.442695, %v2305_v28 }
0x1547   : > { %3149 = vpow2.f32 %v2306_v30 }
0x154f   : > { %v3148_v27 = vpop.eup %3147 }
0x1550   : > { %v2295_v36 = vmul.f32 1.0614054, %v3148_v27 }
0x1551   : > { %v3150_v39 = vpop.eup %3149 }
0x1552   : > { %v2296_v32 = vadd.f32 -1.4531521, %v2295_v36 }
0x1554   : > { %v2297_v21 = vmul.f32 %v3148_v27, %v2296_v32 }
0x1556   : > { %v2298_v34 = vadd.f32 1.4214138, %v2297_v21 }
0x1558   : > { %v2299_v35 = vmul.f32 %v3148_v27, %v2298_v34 }
0x155a   : > { %v2300_v53 = vadd.f32 -0.28449672, %v2299_v35 }
0x155c   : > { %v2301_v44 = vmul.f32 %v3148_v27, %v2300_v53 }
0x155e   : > { %v2302_v37 = vadd.f32 0.2548296, %v2301_v44 }
0x1560   : > { %v2303_v38 = vmul.f32 %v3148_v27, %v2302_v37 }
0x1562   : > { %v2308_v9 = vmul.f32 %v3150_v39, %v2303_v38 }
0x1564   : > { %v2309_v31 = vsub.f32 1.0, %v2308_v9 }
0x1566   : > { %v2310_v45 = vmul.f32 %v2309_v31, %v2289_v54 }
0x1568   : > { %v2311_v46 = vadd.f32 1.0, %v2310_v45 }
0x156a   : > { %v2312_v47 = vmul.f32 %v2311_v46, %v2286_v29 }
0x156c   : > { %v2313_v48 = vpack.c.bf16 %v2312_v47, %v2312_v47 }
0x156e   : > { %2951 = vmatmul.mubr.msk.bf16.vlgmr.msra.gmra.mrb[44].mxu0 %vm1606_vm8, %v2313_v48 }
0x1640   : > { %2361 = sbr.rel (%p2704_p8) target bundleno = 5703 (0x1647), region = 128 }
0x1641   : > { %v2351_v11 = vpop.f32.mrb[44].mxu0 }
0x1642   : > { %v2352_v2 = vadd.f32 %v4415_v23, %v2351_v11  ;;  %v2952_v49 = vpop.f32.mrb[45].mxu0 }
0x1643   : > { %v2354_v50 = vpop.f32.mrb[46].mxu0 }
0x1644   : > { %v2357_v51 = vadd.f32 %v2352_v2, %v2226_v63  ;;  %v2953_v55 = vpop.f32.mrb[47].mxu0 }
0x1646   : > { %2358 = vst.msk [vmem:[#allocation2 + $0x8] sm:$0xff] %vm843_vm1, %v2357_v51  ;;  %2363 = vst.msk [vmem:[#allocation23 + $0x8] sm:$0xff] (!%p2704_p8), %vm843_vm1, %v2357_v51 }
0x1647 PF: > { %p3025_p11 = scmp.eq.s32.totalorder %s3928_s27, 1  ;;  %s3642_s26 = smov [#allocation23]  }
0x1648   : > { %s2373_s24 = sshll.u32 %s3642_s26, 4  ;;  %s2374_s24 = int_to_ptr.vmem [resolvable:$true] %s2373_s24 }
0x1649   : > { %s3509_s11 = scalar_lea.vmem %s2374_s24, 256  ;;  %p3516_p5 = scmp.lt.s32.totalorder %s2374_s24, %s2374_s24 }
0x164a   : > { %p3510_p10 = scmp.ne.s32.totalorder %s2374_s24, %s3509_s11  ;;  %p3517_p9 = scmp.lt.s32.totalorder %s3509_s11, %s3509_s11 }
0x164c   : > { %p3511_p1 = pnand %p3510_p10, %p3025_p11  ;;  %p3518_p0 = por %p3517_p9, %p3516_p5 }
0x164e   : > { %p3512_p12 = pneg %p3511_p1 }
0x1650   : > { %p3519_p13 = pnand %p3518_p0, %p3512_p12 }
0x1652   : > { %3522 = shalt.err (!%p3519_p13)
}
0x1653   : > { %s4694_s28 = sld [smem:[#allocation47_spill]] }
0x1659   : > { %s3523_s12 = scalar_lea.hbm %s4694_s28, 256 }
0x165a   : > { %p3524_p4 = scmp.ne.s32.totalorder %s4694_s28, %s3523_s12  ;;  %p3529_p6 = scmp.lt.u32.totalorder %s3523_s12, %s4694_s28 }
0x165c   : > { %p3525_p2 = pnand %p3524_p4, %p3025_p11 }
0x165e   : > { %p3526_p7 = pneg %p3525_p2 }
0x1660   : > { %p3531_p3 = pnand %p3529_p6, %p3526_p7 }
0x1662   : > { %3534 = shalt.err (!%p3531_p3)
}
0x1663   : > { %s3643_s13 = smov 128  }
0x1664   : > { %2981 = dma.vmem_to_hbm [thread:$0]  (%p3025_p11), %s2374_s24, 256, %s4694_s28, [#allocation5], %s3643_s13, %s3643_s13, %s3638_s0  }
0x1665   : > { %3588 = dma.done.wait (%p3025_p11), [#allocation5], 256  }
0x1666   : > { %3590 = vsyncadd (%p3025_p11), [#allocation5], 4294967040 }
0x1667 PF: > { %s4695_s17 = sld [smem:[#allocation35_spill]]  ;;  %s4696_s10 = sld [smem:[#allocation32_spill]] }
0x1668   : > { %s4697_s23 = sld [smem:[#allocation37_spill]]  ;;  %s4698_s24 = sld [smem:[#allocation34_spill]] }
0x1669   : > { %s4699_s25 = sld [smem:[#allocation36_spill]]  ;;  %s4700_s21 = smov %s3597_s22 }
0x166d   : > { %s42_s26 = sadd.s32 1, %s4695_s17   ;;  %s4701_s22 = smov %s4696_s10 }
0x166e   : > { %p39_p8 = scmp.ge.s32.totalorder %s42_s26, 4  }
0x1670   :  { %41 = sbr.rel (!%p39_p8) target bundleno = 27 (0x1b), region = 246 }
0x1677   :  { %2389 = vsyncpa [#allocation4], 1 }
0x1678   :  { %2391 = vsyncpa [#allocation4 + $0x1], 1 }
0x1679   :  { %2392 = vsyncpa [#allocation7], 1 }
0x167a   :  { %2394 = vsyncpa [#allocation7 + $0x1], 1 }
0x167b   :  { %2395 = vsyncpa [#allocation10], 1 }
0x167c   :  { %2397 = vsyncpa [#allocation10 + $0x1], 1 }
0x167d   :  { %2398 = vsyncpa [#allocation13], 1 }
0x167e   :  { %2400 = vsyncpa [#allocation13 + $0x1], 1 }
0x167f   :  { %2401 = vsyncpa [#allocation16], 1 }
0x1680   :  { %2403 = vsyncpa [#allocation16 + $0x1], 1 }
0x1681   :  { %2404 = vsyncpa [#allocation19], 1 }
0x1682   :  { %2406 = vsyncpa [#allocation19 + $0x1], 1 }
0x1683   :  { %2407 = vsyncpa [#allocation22], 1 }
0x1684   :  { %2409 = vsyncpa [#allocation22 + $0x1], 1 }
0x1685   :  { %2410 = vsyncpa [#allocation5], 1 }
0x1686   :  { %2412 = vsyncpa [#allocation5 + $0x1], 1 }

</bundles_post_ra>
